<compile_context>
chip_gen: v7x
topology: tpu7x:2x2x1
jax: 0.10.0
libtpu: 0.0.40
codegen_flags: <defaults>
</compile_context>

<pallas_src>
import math
from functools import partial

import jax
import jax.numpy as jnp
from jax import lax
from jax.experimental import pallas as pl
from jax.experimental.pallas import tpu as pltpu


def _decoder_layer_kernel(
        x_ref, cos_ref, sinr_ref, ln1_ref,
        wq_ref, wk_ref, wv_ref, wo_ref,
        ln2_ref, wg_ref, wu_ref, wd_ref,
        o_ref,
        xn_ref, k_ref, v_ref, hn_ref,
        *, num_q_heads, num_kv_heads, eps, q_tile):
    S, D = x_ref.shape
    hd = D // num_q_heads
    half = hd // 2
    groups = num_q_heads // num_kv_heads
    scale = 1.0 / math.sqrt(hd)
    tq = q_tile
    neg = jnp.float32(-1e30)

    qi = pl.program_id(1)
    ti = pl.program_id(2)
    q0 = pl.multiple_of(qi * tq, tq)

    def roll_half(t):
        # circular roll by hd//2 within head_dim (XLU work, no permutation matmul)
        if hd % 128 == 0:
            return pltpu.roll(t, half, axis=-1)
        return jnp.concatenate([t[:, half:], t[:, :half]], axis=-1)

    def rope(t, c, sr):
        # sr = sin pre-multiplied by the rotate_half +-1 sign vector (precomputed in the wrapper)
        return t * c + roll_half(t) * sr

    # ------------------------------------------------ phase 1: once per BATCH element
    # full-sequence input RMSNorm + K/V projections + K-RoPE, cached in VMEM scratch for all q-tiles
    @pl.when((qi == 0) & (ti == 0))
    def _kv_phase():
        x_full = x_ref[...]                                              # (S, D) f32
        inv = lax.rsqrt(jnp.mean(x_full * x_full, axis=-1, keepdims=True) + eps)
        xn = (ln1_ref[...] * (x_full * inv)).astype(jnp.bfloat16)        # (S, D) bf16
        xn_ref[...] = xn
        k = jnp.dot(xn, wk_ref[...], preferred_element_type=jnp.float32)  # (S, Hkv*hd)
        v = jnp.dot(xn, wv_ref[...], preferred_element_type=jnp.float32)  # (S, Hkv*hd)
        cos_f = cos_ref[...]
        sinr_f = sinr_ref[...]
        for g in range(num_kv_heads):
            k_ref[g] = rope(k[:, g * hd:(g + 1) * hd], cos_f, sinr_f).astype(jnp.bfloat16)
            v_ref[g] = v[:, g * hd:(g + 1) * hd].astype(jnp.bfloat16)

    # ------------------------------------------------ phase 2: once per q-tile
    # attention (GQA, causal) + residual + post-attention RMSNorm (cached f32 for the MLP steps)
    @pl.when(ti == 0)
    def _attn_phase():
        xn_q = xn_ref[pl.ds(q0, tq), :]                                   # (tq, D) bf16 (no renorm)
        q = jnp.dot(xn_q, wq_ref[...], preferred_element_type=jnp.float32)  # (tq, Hq*hd)
        cos_q = cos_ref[pl.ds(q0, tq), :]
        sinr_q = sinr_ref[pl.ds(q0, tq), :]

        row = q0 + lax.broadcasted_iota(jnp.int32, (tq, S), 0)
        col = lax.broadcasted_iota(jnp.int32, (tq, S), 1)
        causal = col <= row                                               # (tq, S)

        heads_out = []
        for g in range(num_kv_heads):
            # stack this group's q-heads along M -> one tall score matmul and one tall PV matmul
            qg = jnp.concatenate(
                [rope(q[:, h * hd:(h + 1) * hd], cos_q, sinr_q)
                 for h in range(g * groups, (g + 1) * groups)],
                axis=0).astype(jnp.bfloat16)                              # (groups*tq, hd)
            s = lax.dot_general(qg, k_ref[g], (((1,), (1,)), ((), ())),
                                preferred_element_type=jnp.float32) * scale  # (groups*tq, S)
            s = s.reshape(groups, tq, S)
            s = jnp.where(causal, s, neg)
            p = jnp.exp(s - jnp.max(s, axis=-1, keepdims=True))
            p = p / jnp.sum(p, axis=-1, keepdims=True)                    # exact divide
            pv = jnp.dot(p.reshape(groups * tq, S).astype(jnp.bfloat16), v_ref[g],
                         preferred_element_type=jnp.float32)              # (groups*tq, hd)
            for j in range(groups):
                heads_out.append(pv[j * tq:(j + 1) * tq, :])

        attn = jnp.concatenate(heads_out, axis=-1).astype(jnp.bfloat16)   # (tq, Hq*hd) = (tq, D)
        # ONE full-depth o_proj matmul + residual, single store to the output block
        h1 = x_ref[pl.ds(q0, tq), :] + jnp.dot(attn, wo_ref[...],
                                               preferred_element_type=jnp.float32)
        o_ref[...] = h1
        inv_h = lax.rsqrt(jnp.mean(h1 * h1, axis=-1, keepdims=True) + eps)
        hn_ref[...] = ln2_ref[...] * (h1 * inv_h)                         # f32 cache

    # ------------------------------------------------ phase 3: SiLU-gated MLP, streamed over inter tiles
    hn = hn_ref[...].astype(jnp.bfloat16)                                  # (tq, D)
    gate = jnp.dot(hn, wg_ref[...], preferred_element_type=jnp.float32)    # (tq, it)
    up = jnp.dot(hn, wu_ref[...], preferred_element_type=jnp.float32)
    act = gate * jax.nn.sigmoid(gate) * up                                 # SiLU(gate) * up
    o_ref[...] += jnp.dot(act.astype(jnp.bfloat16), wd_ref[...],
                          preferred_element_type=jnp.float32)


def decoder_layer(x, cos, sin, params, *, num_q_heads, num_kv_heads, eps,
                  q_tile=None, inter_tile=None):
    B, S, D = x.shape
    hd = D // num_q_heads
    half = hd // 2
    kvD = num_kv_heads * hd
    inter = params["wg"].shape[1]

    tq = q_tile if q_tile is not None else (256 if (S > 256 and S % 256 == 0) else S)
    it = inter_tile if inter_tile is not None else (512 if (inter > 512 and inter % 512 == 0) else inter)
    assert S % tq == 0 and inter % it == 0
    Tq = S // tq
    Ti = inter // it

    # RoPE tables (S, hd); fold rotate_half's +-1 sign into sin so the in-kernel rotate is roll*mul.
    sign = jnp.concatenate([jnp.full((1, half), -1.0, jnp.float32),
                            jnp.ones((1, half), jnp.float32)], axis=1)
    cos_t = cos[:S].astype(jnp.float32)
    sin_rot = sin[:S].astype(jnp.float32) * sign

    bf = jnp.bfloat16
    ln1 = params["ln1"].astype(jnp.float32)
    ln2 = params["ln2"].astype(jnp.float32)
    wq = params["wq"].astype(bf)
    wk = params["wk"].astype(bf)
    wv = params["wv"].astype(bf)
    wo = params["wo"].astype(bf)
    wg = params["wg"].astype(bf)
    wu = params["wu"].astype(bf)
    wd = params["wd"].astype(bf)

    # Trace-time capability check (review: never a runtime try/except buffering fallback).
    single_buffer = hasattr(pl, "Buffered")

    def const_spec(shape):
        idx = lambda b, qi, ti, _n=len(shape): (0,) * _n
        if single_buffer:
            return pl.BlockSpec(shape, idx, pipeline_mode=pl.Buffered(1))
        return pl.BlockSpec(shape, idx)

    in_specs = [
        pl.BlockSpec((None, S, D), lambda b, qi, ti: (b, 0, 0)),   # x (full sequence per batch elem)
        const_spec((S, hd)), const_spec((S, hd)),                  # cos, signed sin
        const_spec((1, D)),                                        # ln1
        const_spec((D, D)), const_spec((D, kvD)),                  # wq, wk
        const_spec((D, kvD)), const_spec((D, D)),                  # wv, wo
        const_spec((1, D)),                                        # ln2
        pl.BlockSpec((D, it), lambda b, qi, ti: (0, ti)),          # wg tile (streams over ti)
        pl.BlockSpec((D, it), lambda b, qi, ti: (0, ti)),          # wu tile
        pl.BlockSpec((it, D), lambda b, qi, ti: (ti, 0)),          # wd tile
    ]
    out_spec = pl.BlockSpec((None, tq, D), lambda b, qi, ti: (b, qi, 0))

    scratch_shapes = [
        pltpu.VMEM((S, D), bf),                        # cached normalized input (per batch elem)
        pltpu.VMEM((num_kv_heads, S, hd), bf),         # cached RoPE'd K
        pltpu.VMEM((num_kv_heads, S, hd), bf),         # cached V
        pltpu.VMEM((tq, D), jnp.float32),              # cached post-attn RMSNorm (f32)
    ]

    # Explicit VMEM limit from the actual block footprint (+~50% headroom), clamped to sane bounds.
    cbuf = 1 if single_buffer else 2
    footprint = (
        2 * S * D * 4                                   # x block (double-buffered over batch)
        + cbuf * (2 * S * hd + 2 * D) * 4               # cos, sinr, ln1, ln2 (f32)
        + cbuf * (2 * D * D + 2 * D * kvD) * 2          # wq, wo, wk, wv (bf16)
        + 2 * (3 * D * it) * 2                          # wg, wu, wd tiles (bf16, double-buffered)
        + 2 * tq * D * 4                                # output block
        + S * D * 2 + 2 * num_kv_heads * S * hd * 2     # xn / K / V scratch (bf16)
        + tq * D * 4                                    # hn scratch (f32)
    )
    vmem_limit = max(16 << 20, min(int(footprint * 1.5) + (4 << 20), 128 << 20))

    kern = partial(_decoder_layer_kernel, num_q_heads=num_q_heads,
                   num_kv_heads=num_kv_heads, eps=eps, q_tile=tq)

    out = pl.pallas_call(
        kern,
        out_shape=jax.ShapeDtypeStruct((B, S, D), jnp.float32),
        grid_spec=pltpu.PrefetchScalarGridSpec(
            num_scalar_prefetch=0,
            grid=(B, Tq, Ti),
            in_specs=in_specs,
            out_specs=out_spec,
            scratch_shapes=scratch_shapes),
        compiler_params=pltpu.CompilerParams(
            # q-tile axis must be "arbitrary": K/V scratch computed at qi==0 is reused by later qi.
            dimension_semantics=("parallel", "arbitrary", "arbitrary"),
            vmem_limit_bytes=vmem_limit),
    )(x, cos_t, sin_rot, ln1, wq, wk, wv, wo, ln2, wg, wu, wd)
    return out


def reference(x, cos, sin, p, Hq, Hkv, eps):
    """Pure-JAX (f32) mirror of the PyTorch DecoderLayer forward (causal mask, GQA)."""
    B, S, D = x.shape
    hd = D // Hq
    groups = Hq // Hkv
    scale = hd ** -0.5

    def rmsnorm(t, w):
        ms = jnp.mean(t * t, axis=-1, keepdims=True) + eps
        return w * (t / jnp.sqrt(ms))

    def rope(t):  # (B, H, S, hd)
        t1 = t[..., :hd // 2]
        t2 = t[..., hd // 2:]
        rot = jnp.concatenate([-t2, t1], axis=-1)
        return t * cos[:S] + rot * sin[:S]

    xn = rmsnorm(x, p["ln1"])
    q = (xn @ p["wq"]).reshape(B, S, Hq, hd).transpose(0, 2, 1, 3)
    k = (xn @ p["wk"]).reshape(B, S, Hkv, hd).transpose(0, 2, 1, 3)
    v = (xn @ p["wv"]).reshape(B, S, Hkv, hd).transpose(0, 2, 1, 3)
    q = rope(q)
    k = rope(k)
    k = jnp.repeat(k, groups, axis=1)
    v = jnp.repeat(v, groups, axis=1)
    s = jnp.einsum('bhqd,bhkd->bhqk', q, k) * scale
    mask = jnp.tril(jnp.ones((S, S), bool))
    s = jnp.where(mask, s, -jnp.inf)
    a = jax.nn.softmax(s, axis=-1)
    o = jnp.einsum('bhqk,bhkd->bhqd', a, v)
    o = o.transpose(0, 2, 1, 3).reshape(B, S, D) @ p["wo"]
    h1 = x + o
    hn = rmsnorm(h1, p["ln2"])
    return h1 + (jax.nn.silu(hn @ p["wg"]) * (hn @ p["wu"])) @ p["wd"]


if __name__ == "__main__":
    B, S, D = 2, 8, 32
    Hq, Hkv = 4, 2
    hd = D // Hq
    inter = 64
    eps = 1e-6
    rope_theta = 10000.0

    key = jax.random.PRNGKey(0)
    ks = jax.random.split(key, 8)
    x = jax.random.normal(ks[0], (B, S, D), jnp.float32)

    inv_freq = 1.0 / (rope_theta ** (jnp.arange(0, hd, 2, dtype=jnp.float32) / hd))
    pos = jnp.arange(S, dtype=jnp.float32)
    freqs = jnp.outer(pos, inv_freq)
    angles = jnp.concatenate([freqs, freqs], axis=-1)
    cos = jnp.cos(angles)
    sin = jnp.sin(angles)

    def w(k, shape):
        return jax.random.normal(k, shape, jnp.float32) * 0.05

    params = dict(
        ln1=jnp.ones((1, D), jnp.float32),
        ln2=jnp.ones((1, D), jnp.float32),
        wq=w(ks[1], (D, Hq * hd)),
        wk=w(ks[2], (D, Hkv * hd)),
        wv=w(ks[3], (D, Hkv * hd)),
        wo=w(ks[4], (Hq * hd, D)),
        wg=w(ks[5], (D, inter)),
        wu=w(ks[6], (D, inter)),
        wd=w(ks[7], (inter, D)),
    )

    out = decoder_layer(x, cos, sin, params, num_q_heads=Hq, num_kv_heads=Hkv, eps=eps)
    out = jax.block_until_ready(out)

    ref = jax.block_until_ready(reference(x, cos, sin, params, Hq, Hkv, eps))
    assert out.shape == (B, S, D)
    err = float(jnp.max(jnp.abs(out - ref)))
    # bf16 MXU operands (f32 accumulation) -> looser tolerance than pure f32
    assert jnp.allclose(out, ref, atol=5e-2, rtol=5e-2), f"max abs err = {err}"
    print("KERNEL_OK")
</pallas_src>

<mosaic_0001>
module attributes {stable_mosaic.version = 11 : i64} {
  func.func @_decoder_layer_kernel(%arg0: i32, %arg1: i32, %arg2: i32, %arg3: memref<1x8x32xf32, #tpu.memory_space<vmem>>, %arg4: memref<8x8xf32, #tpu.memory_space<vmem>>, %arg5: memref<8x8xf32, #tpu.memory_space<vmem>>, %arg6: memref<1x32xf32, #tpu.memory_space<vmem>>, %arg7: memref<32x32xbf16, #tpu.memory_space<vmem>>, %arg8: memref<32x16xbf16, #tpu.memory_space<vmem>>, %arg9: memref<32x16xbf16, #tpu.memory_space<vmem>>, %arg10: memref<32x32xbf16, #tpu.memory_space<vmem>>, %arg11: memref<1x32xf32, #tpu.memory_space<vmem>>, %arg12: memref<32x64xbf16, #tpu.memory_space<vmem>>, %arg13: memref<32x64xbf16, #tpu.memory_space<vmem>>, %arg14: memref<64x32xbf16, #tpu.memory_space<vmem>>, %arg15: memref<1x8x32xf32, #tpu.memory_space<vmem>>, %arg16: memref<8x32xbf16, #tpu.memory_space<vmem>>, %arg17: memref<2x8x8xbf16, #tpu.memory_space<vmem>>, %arg18: memref<2x8x8xbf16, #tpu.memory_space<vmem>>, %arg19: memref<8x32xf32, #tpu.memory_space<vmem>>) attributes {dimension_semantics = [#tpu.dimension_semantics<parallel>, #tpu.dimension_semantics<arbitrary>, #tpu.dimension_semantics<arbitrary>], iteration_bounds = array<i64: 2, 1, 1>, scalar_prefetch = 0 : i64, scratch_operands = 4 : i64, tpu.core_type = #tpu.core_type<tc>, window_params = [{transform_indices = @transform_0, window_bounds = array<i64: 1, 8, 32>}, {pipeline_mode = #tpu.pipeline_mode<synchronous>, transform_indices = @transform_1, window_bounds = array<i64: 8, 8>}, {pipeline_mode = #tpu.pipeline_mode<synchronous>, transform_indices = @transform_2, window_bounds = array<i64: 8, 8>}, {pipeline_mode = #tpu.pipeline_mode<synchronous>, transform_indices = @transform_3, window_bounds = array<i64: 1, 32>}, {pipeline_mode = #tpu.pipeline_mode<synchronous>, transform_indices = @transform_4, window_bounds = array<i64: 32, 32>}, {pipeline_mode = #tpu.pipeline_mode<synchronous>, transform_indices = @transform_5, window_bounds = array<i64: 32, 16>}, {pipeline_mode = #tpu.pipeline_mode<synchronous>, transform_indices = @transform_6, window_bounds = array<i64: 32, 16>}, {pipeline_mode = #tpu.pipeline_mode<synchronous>, transform_indices = @transform_7, window_bounds = array<i64: 32, 32>}, {pipeline_mode = #tpu.pipeline_mode<synchronous>, transform_indices = @transform_8, window_bounds = array<i64: 1, 32>}, {transform_indices = @transform_9, window_bounds = array<i64: 32, 64>}, {transform_indices = @transform_10, window_bounds = array<i64: 32, 64>}, {transform_indices = @transform_11, window_bounds = array<i64: 64, 32>}, {transform_indices = @transform_12, window_bounds = array<i64: 1, 8, 32>}]} {
    %c8_i32 = arith.constant 8 : i32
    %0 = arith.muli %arg1, %c8_i32 : i32
    %1 = tpu.assume_multiple %0, 8 : i32
    %c0_i32 = arith.constant 0 : i32
    %2 = arith.cmpi eq, %arg1, %c0_i32 : i32
    %c0_i32_0 = arith.constant 0 : i32
    %3 = arith.cmpi eq, %arg2, %c0_i32_0 : i32
    %4 = arith.andi %2, %3 : i1
    %5 = arith.extui %4 : i1 to i32
    %c0_i32_1 = arith.constant 0 : i32
    %6 = arith.cmpi ne, %5, %c0_i32_1 : i32
    scf.if %6 {
      %c0_21 = arith.constant 0 : index
      %c0_22 = arith.constant 0 : index
      %c0_23 = arith.constant 0 : index
      %32 = vector.load %arg3[%c0_21, %c0_22, %c0_23] : memref<1x8x32xf32, #tpu.memory_space<vmem>>, vector<1x8x32xf32>
      %33 = vector.shape_cast %32 : vector<1x8x32xf32> to vector<8x32xf32>
      %34 = arith.mulf %33, %33 : vector<8x32xf32>
      %cst_24 = arith.constant dense<0.000000e+00> : vector<8xf32>
      %35 = vector.multi_reduction <add>, %34, %cst_24 [1] : vector<8x32xf32> to vector<8xf32>
      %36 = vector.shape_cast %35 : vector<8xf32> to vector<8x1xf32>
      %cst_25 = arith.constant 3.200000e+01 : f32
      %37 = vector.broadcast %cst_25 : f32 to vector<8x1xf32>
      %38 = arith.divf %36, %37 : vector<8x1xf32>
      %cst_26 = arith.constant 9.99999997E-7 : f32
      %39 = vector.broadcast %cst_26 : f32 to vector<8x1xf32>
      %40 = arith.addf %38, %39 : vector<8x1xf32>
      %41 = math.rsqrt %40 : vector<8x1xf32>
      %c0_27 = arith.constant 0 : index
      %c0_28 = arith.constant 0 : index
      %42 = vector.load %arg6[%c0_27, %c0_28] : memref<1x32xf32, #tpu.memory_space<vmem>>, vector<1x32xf32>
      %43 = vector.broadcast %41 : vector<8x1xf32> to vector<8x32xf32>
      %44 = arith.mulf %33, %43 : vector<8x32xf32>
      %45 = vector.broadcast %42 : vector<1x32xf32> to vector<8x32xf32>
      %46 = arith.mulf %45, %44 : vector<8x32xf32>
      %47 = arith.truncf %46 : vector<8x32xf32> to vector<8x32xbf16>
      %c0_29 = arith.constant 0 : index
      %c0_30 = arith.constant 0 : index
      %48 = vector.load %arg16[%c0_29, %c0_30] : memref<8x32xbf16, #tpu.memory_space<vmem>>, vector<8x32xbf16>
      tpu.vector_store %arg16[%c0_29, %c0_30], %47 {strides = array<i32>} : memref<8x32xbf16, #tpu.memory_space<vmem>>, vector<8x32xbf16>,
      %c0_31 = arith.constant 0 : index
      %c0_32 = arith.constant 0 : index
      %49 = vector.load %arg8[%c0_31, %c0_32] : memref<32x16xbf16, #tpu.memory_space<vmem>>, vector<32x16xbf16>
      %cst_33 = arith.constant dense<0.000000e+00> : vector<8x16xf32>
      %50 = tpu.matmul %47, %49, %cst_33 {dimension_numbers = #tpu.dot_dimension_numbers<[1], [0], [0], [1], [0, 0, 1, 1], [], []>} : vector<8x32xbf16>, vector<32x16xbf16>, vector<8x16xf32> -> vector<8x16xf32>
      %c0_34 = arith.constant 0 : index
      %c0_35 = arith.constant 0 : index
      %51 = vector.load %arg9[%c0_34, %c0_35] : memref<32x16xbf16, #tpu.memory_space<vmem>>, vector<32x16xbf16>
      %cst_36 = arith.constant dense<0.000000e+00> : vector<8x16xf32>
      %52 = tpu.matmul %47, %51, %cst_36 {dimension_numbers = #tpu.dot_dimension_numbers<[1], [0], [0], [1], [0, 0, 1, 1], [], []>} : vector<8x32xbf16>, vector<32x16xbf16>, vector<8x16xf32> -> vector<8x16xf32>
      %c0_37 = arith.constant 0 : index
      %c0_38 = arith.constant 0 : index
      %53 = vector.load %arg4[%c0_37, %c0_38] : memref<8x8xf32, #tpu.memory_space<vmem>>, vector<8x8xf32>
      %c0_39 = arith.constant 0 : index
      %c0_40 = arith.constant 0 : index
      %54 = vector.load %arg5[%c0_39, %c0_40] : memref<8x8xf32, #tpu.memory_space<vmem>>, vector<8x8xf32>
      %55 = vector.extract_strided_slice %50 {offsets = [0, 0], sizes = [8, 8], strides = [1, 1]} : vector<8x16xf32> to vector<8x8xf32>
      %56 = arith.mulf %55, %53 : vector<8x8xf32>
      %57 = vector.extract_strided_slice %55 {offsets = [0, 4], sizes = [8, 4], strides = [1, 1]} : vector<8x8xf32> to vector<8x4xf32>
      %58 = vector.extract_strided_slice %55 {offsets = [0, 0], sizes = [8, 4], strides = [1, 1]} : vector<8x8xf32> to vector<8x4xf32>
      %59 = tpu.concatenate %57, %58 in 1 : vector<8x4xf32>, vector<8x4xf32> -> vector<8x8xf32>
      %60 = arith.mulf %59, %54 : vector<8x8xf32>
      %61 = arith.addf %56, %60 : vector<8x8xf32>
      %62 = arith.truncf %61 : vector<8x8xf32> to vector<8x8xbf16>
      %c0_41 = arith.constant 0 : index
      %c0_42 = arith.constant 0 : index
      %c0_43 = arith.constant 0 : index
      %63 = vector.load %arg17[%c0_41, %c0_42, %c0_43] : memref<2x8x8xbf16, #tpu.memory_space<vmem>>, vector<1x8x8xbf16>
      %64 = vector.shape_cast %63 : vector<1x8x8xbf16> to vector<8x8xbf16>
      %65 = vector.shape_cast %62 : vector<8x8xbf16> to vector<1x8x8xbf16>
      tpu.vector_store %arg17[%c0_41, %c0_42, %c0_43], %65 {strides = array<i32>} : memref<2x8x8xbf16, #tpu.memory_space<vmem>>, vector<1x8x8xbf16>,
      %66 = vector.extract_strided_slice %52 {offsets = [0, 0], sizes = [8, 8], strides = [1, 1]} : vector<8x16xf32> to vector<8x8xf32>
      %67 = arith.truncf %66 : vector<8x8xf32> to vector<8x8xbf16>
      %c0_44 = arith.constant 0 : index
      %c0_45 = arith.constant 0 : index
      %c0_46 = arith.constant 0 : index
      %68 = vector.load %arg18[%c0_44, %c0_45, %c0_46] : memref<2x8x8xbf16, #tpu.memory_space<vmem>>, vector<1x8x8xbf16>
      %69 = vector.shape_cast %68 : vector<1x8x8xbf16> to vector<8x8xbf16>
      %70 = vector.shape_cast %67 : vector<8x8xbf16> to vector<1x8x8xbf16>
      tpu.vector_store %arg18[%c0_44, %c0_45, %c0_46], %70 {strides = array<i32>} : memref<2x8x8xbf16, #tpu.memory_space<vmem>>, vector<1x8x8xbf16>,
      %71 = vector.extract_strided_slice %50 {offsets = [0, 8], sizes = [8, 8], strides = [1, 1]} : vector<8x16xf32> to vector<8x8xf32>
      %72 = arith.mulf %71, %53 : vector<8x8xf32>
      %73 = vector.extract_strided_slice %71 {offsets = [0, 4], sizes = [8, 4], strides = [1, 1]} : vector<8x8xf32> to vector<8x4xf32>
      %74 = vector.extract_strided_slice %71 {offsets = [0, 0], sizes = [8, 4], strides = [1, 1]} : vector<8x8xf32> to vector<8x4xf32>
      %75 = tpu.concatenate %73, %74 in 1 : vector<8x4xf32>, vector<8x4xf32> -> vector<8x8xf32>
      %76 = arith.mulf %75, %54 : vector<8x8xf32>
      %77 = arith.addf %72, %76 : vector<8x8xf32>
      %78 = arith.truncf %77 : vector<8x8xf32> to vector<8x8xbf16>
      %c1 = arith.constant 1 : index
      %c0_47 = arith.constant 0 : index
      %c0_48 = arith.constant 0 : index
      %79 = vector.load %arg17[%c1, %c0_47, %c0_48] : memref<2x8x8xbf16, #tpu.memory_space<vmem>>, vector<1x8x8xbf16>
      %80 = vector.shape_cast %79 : vector<1x8x8xbf16> to vector<8x8xbf16>
      %81 = vector.shape_cast %78 : vector<8x8xbf16> to vector<1x8x8xbf16>
      tpu.vector_store %arg17[%c1, %c0_47, %c0_48], %81 {strides = array<i32>} : memref<2x8x8xbf16, #tpu.memory_space<vmem>>, vector<1x8x8xbf16>,
      %82 = vector.extract_strided_slice %52 {offsets = [0, 8], sizes = [8, 8], strides = [1, 1]} : vector<8x16xf32> to vector<8x8xf32>
      %83 = arith.truncf %82 : vector<8x8xf32> to vector<8x8xbf16>
      %c1_49 = arith.constant 1 : index
      %c0_50 = arith.constant 0 : index
      %c0_51 = arith.constant 0 : index
      %84 = vector.load %arg18[%c1_49, %c0_50, %c0_51] : memref<2x8x8xbf16, #tpu.memory_space<vmem>>, vector<1x8x8xbf16>
      %85 = vector.shape_cast %84 : vector<1x8x8xbf16> to vector<8x8xbf16>
      %86 = vector.shape_cast %83 : vector<8x8xbf16> to vector<1x8x8xbf16>
      tpu.vector_store %arg18[%c1_49, %c0_50, %c0_51], %86 {strides = array<i32>} : memref<2x8x8xbf16, #tpu.memory_space<vmem>>, vector<1x8x8xbf16>,
    } else {
    }
    %c0_i32_2 = arith.constant 0 : i32
    %7 = arith.cmpi eq, %arg2, %c0_i32_2 : i32
    %8 = arith.extui %7 : i1 to i32
    %cst = arith.constant -1.000000e+30 : f32
    %c0_i32_3 = arith.constant 0 : i32
    %9 = arith.cmpi ne, %8, %c0_i32_3 : i32
    scf.if %9 {
      %32 = arith.index_cast %1 : i32 to index
      %c0_21 = arith.constant 0 : index
      %33 = vector.load %arg16[%32, %c0_21] : memref<8x32xbf16, #tpu.memory_space<vmem>>, vector<8x32xbf16>
      %c0_22 = arith.constant 0 : index
      %c0_23 = arith.constant 0 : index
      %34 = vector.load %arg7[%c0_22, %c0_23] : memref<32x32xbf16, #tpu.memory_space<vmem>>, vector<32x32xbf16>
      %cst_24 = arith.constant dense<0.000000e+00> : vector<8x32xf32>
      %35 = tpu.matmul %33, %34, %cst_24 {dimension_numbers = #tpu.dot_dimension_numbers<[1], [0], [0], [1], [0, 0, 1, 1], [], []>} : vector<8x32xbf16>, vector<32x32xbf16>, vector<8x32xf32> -> vector<8x32xf32>
      %36 = arith.index_cast %1 : i32 to index
      %c0_25 = arith.constant 0 : index
      %37 = vector.load %arg4[%36, %c0_25] : memref<8x8xf32, #tpu.memory_space<vmem>>, vector<8x8xf32>
      %38 = arith.index_cast %1 : i32 to index
      %c0_26 = arith.constant 0 : index
      %39 = vector.load %arg5[%38, %c0_26] : memref<8x8xf32, #tpu.memory_space<vmem>>, vector<8x8xf32>
      %40 = tpu.iota {dimensions = array<i32: 0>} : vector<8x8xi32>
      %41 = vector.broadcast %1 : i32 to vector<8x8xi32>
      %42 = arith.addi %41, %40 : vector<8x8xi32>
      %43 = tpu.iota {dimensions = array<i32: 1>} : vector<8x8xi32>
      %44 = arith.cmpi sle, %43, %42 : vector<8x8xi32>
      %45 = vector.extract_strided_slice %35 {offsets = [0, 0], sizes = [8, 8], strides = [1, 1]} : vector<8x32xf32> to vector<8x8xf32>
      %46 = arith.mulf %45, %37 : vector<8x8xf32>
      %47 = vector.extract_strided_slice %45 {offsets = [0, 4], sizes = [8, 4], strides = [1, 1]} : vector<8x8xf32> to vector<8x4xf32>
      %48 = vector.extract_strided_slice %45 {offsets = [0, 0], sizes = [8, 4], strides = [1, 1]} : vector<8x8xf32> to vector<8x4xf32>
      %49 = tpu.concatenate %47, %48 in 1 : vector<8x4xf32>, vector<8x4xf32> -> vector<8x8xf32>
      %50 = arith.mulf %49, %39 : vector<8x8xf32>
      %51 = arith.addf %46, %50 : vector<8x8xf32>
      %52 = vector.extract_strided_slice %35 {offsets = [0, 8], sizes = [8, 8], strides = [1, 1]} : vector<8x32xf32> to vector<8x8xf32>
      %53 = arith.mulf %52, %37 : vector<8x8xf32>
      %54 = vector.extract_strided_slice %52 {offsets = [0, 4], sizes = [8, 4], strides = [1, 1]} : vector<8x8xf32> to vector<8x4xf32>
      %55 = vector.extract_strided_slice %52 {offsets = [0, 0], sizes = [8, 4], strides = [1, 1]} : vector<8x8xf32> to vector<8x4xf32>
      %56 = tpu.concatenate %54, %55 in 1 : vector<8x4xf32>, vector<8x4xf32> -> vector<8x8xf32>
      %57 = arith.mulf %56, %39 : vector<8x8xf32>
      %58 = arith.addf %53, %57 : vector<8x8xf32>
      %59 = tpu.concatenate %51, %58 in 0 : vector<8x8xf32>, vector<8x8xf32> -> vector<16x8xf32>
      %60 = arith.truncf %59 : vector<16x8xf32> to vector<16x8xbf16>
      %c0_27 = arith.constant 0 : index
      %c0_28 = arith.constant 0 : index
      %c0_29 = arith.constant 0 : index
      %61 = vector.load %arg17[%c0_27, %c0_28, %c0_29] : memref<2x8x8xbf16, #tpu.memory_space<vmem>>, vector<1x8x8xbf16>
      %62 = vector.shape_cast %61 : vector<1x8x8xbf16> to vector<8x8xbf16>
      %cst_30 = arith.constant dense<0.000000e+00> : vector<16x8xf32>
      %63 = tpu.matmul %60, %62, %cst_30 {dimension_numbers = #tpu.dot_dimension_numbers<[1], [1], [0], [0], [0, 0, 1, 0], [], []>} : vector<16x8xbf16>, vector<8x8xbf16>, vector<16x8xf32> -> vector<16x8xf32>
      %cst_31 = arith.constant 0.353553385 : f32
      %64 = vector.broadcast %cst_31 : f32 to vector<16x8xf32>
      %65 = arith.mulf %63, %64 : vector<16x8xf32>
      %66 = vector.shape_cast %65 : vector<16x8xf32> to vector<2x8x8xf32>
      %67 = vector.shape_cast %44 : vector<8x8xi1> to vector<1x8x8xi1>
      %68 = vector.broadcast %67 : vector<1x8x8xi1> to vector<2x8x8xi1>
      %69 = vector.broadcast %cst : f32 to vector<2x8x8xf32>
      %70 = arith.select %68, %66, %69 : vector<2x8x8xi1>, vector<2x8x8xf32>
      %cst_32 = arith.constant dense<0xFF800000> : vector<2x8xf32>
      %71 = vector.multi_reduction <maximumf>, %70, %cst_32 [2] : vector<2x8x8xf32> to vector<2x8xf32>
      %72 = vector.shape_cast %71 : vector<2x8xf32> to vector<2x8x1xf32>
      %73 = vector.broadcast %72 : vector<2x8x1xf32> to vector<2x8x8xf32>
      %74 = arith.subf %70, %73 : vector<2x8x8xf32>
      %75 = math.exp %74 : vector<2x8x8xf32>
      %cst_33 = arith.constant dense<0.000000e+00> : vector<2x8xf32>
      %76 = vector.multi_reduction <add>, %75, %cst_33 [2] : vector<2x8x8xf32> to vector<2x8xf32>
      %77 = vector.shape_cast %76 : vector<2x8xf32> to vector<2x8x1xf32>
      %78 = vector.broadcast %77 : vector<2x8x1xf32> to vector<2x8x8xf32>
      %79 = arith.divf %75, %78 : vector<2x8x8xf32>
      %80 = vector.shape_cast %79 : vector<2x8x8xf32> to vector<16x8xf32>
      %81 = arith.truncf %80 : vector<16x8xf32> to vector<16x8xbf16>
      %c0_34 = arith.constant 0 : index
      %c0_35 = arith.constant 0 : index
      %c0_36 = arith.constant 0 : index
      %82 = vector.load %arg18[%c0_34, %c0_35, %c0_36] : memref<2x8x8xbf16, #tpu.memory_space<vmem>>, vector<1x8x8xbf16>
      %83 = vector.shape_cast %82 : vector<1x8x8xbf16> to vector<8x8xbf16>
      %cst_37 = arith.constant dense<0.000000e+00> : vector<16x8xf32>
      %84 = tpu.matmul %81, %83, %cst_37 {dimension_numbers = #tpu.dot_dimension_numbers<[1], [0], [0], [1], [0, 0, 1, 1], [], []>} : vector<16x8xbf16>, vector<8x8xbf16>, vector<16x8xf32> -> vector<16x8xf32>
      %85 = vector.extract_strided_slice %84 {offsets = [0, 0], sizes = [8, 8], strides = [1, 1]} : vector<16x8xf32> to vector<8x8xf32>
      %86 = vector.extract_strided_slice %84 {offsets = [8, 0], sizes = [8, 8], strides = [1, 1]} : vector<16x8xf32> to vector<8x8xf32>
      %87 = vector.extract_strided_slice %35 {offsets = [0, 16], sizes = [8, 8], strides = [1, 1]} : vector<8x32xf32> to vector<8x8xf32>
      %88 = arith.mulf %87, %37 : vector<8x8xf32>
      %89 = vector.extract_strided_slice %87 {offsets = [0, 4], sizes = [8, 4], strides = [1, 1]} : vector<8x8xf32> to vector<8x4xf32>
      %90 = vector.extract_strided_slice %87 {offsets = [0, 0], sizes = [8, 4], strides = [1, 1]} : vector<8x8xf32> to vector<8x4xf32>
      %91 = tpu.concatenate %89, %90 in 1 : vector<8x4xf32>, vector<8x4xf32> -> vector<8x8xf32>
      %92 = arith.mulf %91, %39 : vector<8x8xf32>
      %93 = arith.addf %88, %92 : vector<8x8xf32>
      %94 = vector.extract_strided_slice %35 {offsets = [0, 24], sizes = [8, 8], strides = [1, 1]} : vector<8x32xf32> to vector<8x8xf32>
      %95 = arith.mulf %94, %37 : vector<8x8xf32>
      %96 = vector.extract_strided_slice %94 {offsets = [0, 4], sizes = [8, 4], strides = [1, 1]} : vector<8x8xf32> to vector<8x4xf32>
      %97 = vector.extract_strided_slice %94 {offsets = [0, 0], sizes = [8, 4], strides = [1, 1]} : vector<8x8xf32> to vector<8x4xf32>
      %98 = tpu.concatenate %96, %97 in 1 : vector<8x4xf32>, vector<8x4xf32> -> vector<8x8xf32>
      %99 = arith.mulf %98, %39 : vector<8x8xf32>
      %100 = arith.addf %95, %99 : vector<8x8xf32>
      %101 = tpu.concatenate %93, %100 in 0 : vector<8x8xf32>, vector<8x8xf32> -> vector<16x8xf32>
      %102 = arith.truncf %101 : vector<16x8xf32> to vector<16x8xbf16>
      %c1 = arith.constant 1 : index
      %c0_38 = arith.constant 0 : index
      %c0_39 = arith.constant 0 : index
      %103 = vector.load %arg17[%c1, %c0_38, %c0_39] : memref<2x8x8xbf16, #tpu.memory_space<vmem>>, vector<1x8x8xbf16>
      %104 = vector.shape_cast %103 : vector<1x8x8xbf16> to vector<8x8xbf16>
      %cst_40 = arith.constant dense<0.000000e+00> : vector<16x8xf32>
      %105 = tpu.matmul %102, %104, %cst_40 {dimension_numbers = #tpu.dot_dimension_numbers<[1], [1], [0], [0], [0, 0, 1, 0], [], []>} : vector<16x8xbf16>, vector<8x8xbf16>, vector<16x8xf32> -> vector<16x8xf32>
      %cst_41 = arith.constant 0.353553385 : f32
      %106 = vector.broadcast %cst_41 : f32 to vector<16x8xf32>
      %107 = arith.mulf %105, %106 : vector<16x8xf32>
      %108 = vector.shape_cast %107 : vector<16x8xf32> to vector<2x8x8xf32>
      %109 = vector.shape_cast %44 : vector<8x8xi1> to vector<1x8x8xi1>
      %110 = vector.broadcast %109 : vector<1x8x8xi1> to vector<2x8x8xi1>
      %111 = vector.broadcast %cst : f32 to vector<2x8x8xf32>
      %112 = arith.select %110, %108, %111 : vector<2x8x8xi1>, vector<2x8x8xf32>
      %cst_42 = arith.constant dense<0xFF800000> : vector<2x8xf32>
      %113 = vector.multi_reduction <maximumf>, %112, %cst_42 [2] : vector<2x8x8xf32> to vector<2x8xf32>
      %114 = vector.shape_cast %113 : vector<2x8xf32> to vector<2x8x1xf32>
      %115 = vector.broadcast %114 : vector<2x8x1xf32> to vector<2x8x8xf32>
      %116 = arith.subf %112, %115 : vector<2x8x8xf32>
      %117 = math.exp %116 : vector<2x8x8xf32>
      %cst_43 = arith.constant dense<0.000000e+00> : vector<2x8xf32>
      %118 = vector.multi_reduction <add>, %117, %cst_43 [2] : vector<2x8x8xf32> to vector<2x8xf32>
      %119 = vector.shape_cast %118 : vector<2x8xf32> to vector<2x8x1xf32>
      %120 = vector.broadcast %119 : vector<2x8x1xf32> to vector<2x8x8xf32>
      %121 = arith.divf %117, %120 : vector<2x8x8xf32>
      %122 = vector.shape_cast %121 : vector<2x8x8xf32> to vector<16x8xf32>
      %123 = arith.truncf %122 : vector<16x8xf32> to vector<16x8xbf16>
      %c1_44 = arith.constant 1 : index
      %c0_45 = arith.constant 0 : index
      %c0_46 = arith.constant 0 : index
      %124 = vector.load %arg18[%c1_44, %c0_45, %c0_46] : memref<2x8x8xbf16, #tpu.memory_space<vmem>>, vector<1x8x8xbf16>
      %125 = vector.shape_cast %124 : vector<1x8x8xbf16> to vector<8x8xbf16>
      %cst_47 = arith.constant dense<0.000000e+00> : vector<16x8xf32>
      %126 = tpu.matmul %123, %125, %cst_47 {dimension_numbers = #tpu.dot_dimension_numbers<[1], [0], [0], [1], [0, 0, 1, 1], [], []>} : vector<16x8xbf16>, vector<8x8xbf16>, vector<16x8xf32> -> vector<16x8xf32>
      %127 = vector.extract_strided_slice %126 {offsets = [0, 0], sizes = [8, 8], strides = [1, 1]} : vector<16x8xf32> to vector<8x8xf32>
      %128 = vector.extract_strided_slice %126 {offsets = [8, 0], sizes = [8, 8], strides = [1, 1]} : vector<16x8xf32> to vector<8x8xf32>
      %129 = tpu.concatenate %85, %86, %127, %128 in 1 : vector<8x8xf32>, vector<8x8xf32>, vector<8x8xf32>, vector<8x8xf32> -> vector<8x32xf32>
      %130 = arith.truncf %129 : vector<8x32xf32> to vector<8x32xbf16>
      %c0_48 = arith.constant 0 : index
      %131 = arith.index_cast %1 : i32 to index
      %c0_49 = arith.constant 0 : index
      %132 = vector.load %arg3[%c0_48, %131, %c0_49] : memref<1x8x32xf32, #tpu.memory_space<vmem>>, vector<1x8x32xf32>
      %133 = vector.shape_cast %132 : vector<1x8x32xf32> to vector<8x32xf32>
      %c0_50 = arith.constant 0 : index
      %c0_51 = arith.constant 0 : index
      %134 = vector.load %arg10[%c0_50, %c0_51] : memref<32x32xbf16, #tpu.memory_space<vmem>>, vector<32x32xbf16>
      %cst_52 = arith.constant dense<0.000000e+00> : vector<8x32xf32>
      %135 = tpu.matmul %130, %134, %cst_52 {dimension_numbers = #tpu.dot_dimension_numbers<[1], [0], [0], [1], [0, 0, 1, 1], [], []>} : vector<8x32xbf16>, vector<32x32xbf16>, vector<8x32xf32> -> vector<8x32xf32>
      %136 = arith.addf %133, %135 : vector<8x32xf32>
      %c0_53 = arith.constant 0 : index
      %c0_54 = arith.constant 0 : index
      %c0_55 = arith.constant 0 : index
      %137 = vector.load %arg15[%c0_53, %c0_54, %c0_55] : memref<1x8x32xf32, #tpu.memory_space<vmem>>, vector<1x8x32xf32>
      %138 = vector.shape_cast %137 : vector<1x8x32xf32> to vector<8x32xf32>
      %139 = vector.shape_cast %136 : vector<8x32xf32> to vector<1x8x32xf32>
      tpu.vector_store %arg15[%c0_53, %c0_54, %c0_55], %139 {strides = array<i32>} : memref<1x8x32xf32, #tpu.memory_space<vmem>>, vector<1x8x32xf32>,
      %140 = arith.mulf %136, %136 : vector<8x32xf32>
      %cst_56 = arith.constant dense<0.000000e+00> : vector<8xf32>
      %141 = vector.multi_reduction <add>, %140, %cst_56 [1] : vector<8x32xf32> to vector<8xf32>
      %142 = vector.shape_cast %141 : vector<8xf32> to vector<8x1xf32>
      %cst_57 = arith.constant 3.200000e+01 : f32
      %143 = vector.broadcast %cst_57 : f32 to vector<8x1xf32>
      %144 = arith.divf %142, %143 : vector<8x1xf32>
      %cst_58 = arith.constant 9.99999997E-7 : f32
      %145 = vector.broadcast %cst_58 : f32 to vector<8x1xf32>
      %146 = arith.addf %144, %145 : vector<8x1xf32>
      %147 = math.rsqrt %146 : vector<8x1xf32>
      %c0_59 = arith.constant 0 : index
      %c0_60 = arith.constant 0 : index
      %148 = vector.load %arg11[%c0_59, %c0_60] : memref<1x32xf32, #tpu.memory_space<vmem>>, vector<1x32xf32>
      %149 = vector.broadcast %147 : vector<8x1xf32> to vector<8x32xf32>
      %150 = arith.mulf %136, %149 : vector<8x32xf32>
      %151 = vector.broadcast %148 : vector<1x32xf32> to vector<8x32xf32>
      %152 = arith.mulf %151, %150 : vector<8x32xf32>
      %c0_61 = arith.constant 0 : index
      %c0_62 = arith.constant 0 : index
      %153 = vector.load %arg19[%c0_61, %c0_62] : memref<8x32xf32, #tpu.memory_space<vmem>>, vector<8x32xf32>
      tpu.vector_store %arg19[%c0_61, %c0_62], %152 {strides = array<i32>} : memref<8x32xf32, #tpu.memory_space<vmem>>, vector<8x32xf32>,
    } else {
    }
    %c0 = arith.constant 0 : index
    %c0_4 = arith.constant 0 : index
    %10 = vector.load %arg19[%c0, %c0_4] : memref<8x32xf32, #tpu.memory_space<vmem>>, vector<8x32xf32>
    %11 = arith.truncf %10 : vector<8x32xf32> to vector<8x32xbf16>
    %c0_5 = arith.constant 0 : index
    %c0_6 = arith.constant 0 : index
    %12 = vector.load %arg12[%c0_5, %c0_6] : memref<32x64xbf16, #tpu.memory_space<vmem>>, vector<32x64xbf16>
    %cst_7 = arith.constant dense<0.000000e+00> : vector<8x64xf32>
    %13 = tpu.matmul %11, %12, %cst_7 {dimension_numbers = #tpu.dot_dimension_numbers<[1], [0], [0], [1], [0, 0, 1, 1], [], []>} : vector<8x32xbf16>, vector<32x64xbf16>, vector<8x64xf32> -> vector<8x64xf32>
    %c0_8 = arith.constant 0 : index
    %c0_9 = arith.constant 0 : index
    %14 = vector.load %arg13[%c0_8, %c0_9] : memref<32x64xbf16, #tpu.memory_space<vmem>>, vector<32x64xbf16>
    %cst_10 = arith.constant dense<0.000000e+00> : vector<8x64xf32>
    %15 = tpu.matmul %11, %14, %cst_10 {dimension_numbers = #tpu.dot_dimension_numbers<[1], [0], [0], [1], [0, 0, 1, 1], [], []>} : vector<8x32xbf16>, vector<32x64xbf16>, vector<8x64xf32> -> vector<8x64xf32>
    %16 = arith.negf %13 : vector<8x64xf32>
    %17 = math.exp %16 : vector<8x64xf32>
    %cst_11 = arith.constant 1.000000e+00 : f32
    %18 = vector.broadcast %cst_11 : f32 to vector<8x64xf32>
    %19 = arith.addf %18, %17 : vector<8x64xf32>
    %20 = arith.divf %18, %19 : vector<8x64xf32>
    %21 = arith.mulf %13, %20 : vector<8x64xf32>
    %22 = arith.mulf %21, %15 : vector<8x64xf32>
    %c0_12 = arith.constant 0 : index
    %c0_13 = arith.constant 0 : index
    %c0_14 = arith.constant 0 : index
    %23 = vector.load %arg15[%c0_12, %c0_13, %c0_14] : memref<1x8x32xf32, #tpu.memory_space<vmem>>, vector<1x8x32xf32>
    %24 = vector.shape_cast %23 : vector<1x8x32xf32> to vector<8x32xf32>
    %25 = arith.truncf %22 : vector<8x64xf32> to vector<8x64xbf16>
    %c0_15 = arith.constant 0 : index
    %c0_16 = arith.constant 0 : index
    %26 = vector.load %arg14[%c0_15, %c0_16] : memref<64x32xbf16, #tpu.memory_space<vmem>>, vector<64x32xbf16>
    %cst_17 = arith.constant dense<0.000000e+00> : vector<8x32xf32>
    %27 = tpu.matmul %25, %26, %cst_17 {dimension_numbers = #tpu.dot_dimension_numbers<[1], [0], [0], [1], [0, 0, 1, 1], [], []>} : vector<8x64xbf16>, vector<64x32xbf16>, vector<8x32xf32> -> vector<8x32xf32>
    %28 = arith.addf %24, %27 : vector<8x32xf32>
    %c0_18 = arith.constant 0 : index
    %c0_19 = arith.constant 0 : index
    %c0_20 = arith.constant 0 : index
    %29 = vector.load %arg15[%c0_18, %c0_19, %c0_20] : memref<1x8x32xf32, #tpu.memory_space<vmem>>, vector<1x8x32xf32>
    %30 = vector.shape_cast %29 : vector<1x8x32xf32> to vector<8x32xf32>
    %31 = vector.shape_cast %28 : vector<8x32xf32> to vector<1x8x32xf32>
    tpu.vector_store %arg15[%c0_18, %c0_19, %c0_20], %31 {strides = array<i32>} : memref<1x8x32xf32, #tpu.memory_space<vmem>>, vector<1x8x32xf32>,
    return
  }
  func.func @transform_0(%arg0: i32, %arg1: i32, %arg2: i32) -> (i32, i32, i32) {
    %c0_i32 = arith.constant 0 : i32
    %c0_i32_0 = arith.constant 0 : i32
    %c0_i32_1 = arith.constant 0 : i32
    return %arg0, %c0_i32, %c0_i32_0 : i32, i32, i32
  }
  func.func @transform_1(%arg0: i32, %arg1: i32, %arg2: i32) -> (i32, i32) {
    %c0_i32 = arith.constant 0 : i32
    %c0_i32_0 = arith.constant 0 : i32
    %c0_i32_1 = arith.constant 0 : i32
    return %c0_i32, %c0_i32_0 : i32, i32
  }
  func.func @transform_2(%arg0: i32, %arg1: i32, %arg2: i32) -> (i32, i32) {
    %c0_i32 = arith.constant 0 : i32
    %c0_i32_0 = arith.constant 0 : i32
    %c0_i32_1 = arith.constant 0 : i32
    return %c0_i32, %c0_i32_0 : i32, i32
  }
  func.func @transform_3(%arg0: i32, %arg1: i32, %arg2: i32) -> (i32, i32) {
    %c0_i32 = arith.constant 0 : i32
    %c0_i32_0 = arith.constant 0 : i32
    %c0_i32_1 = arith.constant 0 : i32
    return %c0_i32, %c0_i32_0 : i32, i32
  }
  func.func @transform_4(%arg0: i32, %arg1: i32, %arg2: i32) -> (i32, i32) {
    %c0_i32 = arith.constant 0 : i32
    %c0_i32_0 = arith.constant 0 : i32
    %c0_i32_1 = arith.constant 0 : i32
    return %c0_i32, %c0_i32_0 : i32, i32
  }
  func.func @transform_5(%arg0: i32, %arg1: i32, %arg2: i32) -> (i32, i32) {
    %c0_i32 = arith.constant 0 : i32
    %c0_i32_0 = arith.constant 0 : i32
    %c0_i32_1 = arith.constant 0 : i32
    return %c0_i32, %c0_i32_0 : i32, i32
  }
  func.func @transform_6(%arg0: i32, %arg1: i32, %arg2: i32) -> (i32, i32) {
    %c0_i32 = arith.constant 0 : i32
    %c0_i32_0 = arith.constant 0 : i32
    %c0_i32_1 = arith.constant 0 : i32
    return %c0_i32, %c0_i32_0 : i32, i32
  }
  func.func @transform_7(%arg0: i32, %arg1: i32, %arg2: i32) -> (i32, i32) {
    %c0_i32 = arith.constant 0 : i32
    %c0_i32_0 = arith.constant 0 : i32
    %c0_i32_1 = arith.constant 0 : i32
    return %c0_i32, %c0_i32_0 : i32, i32
  }
  func.func @transform_8(%arg0: i32, %arg1: i32, %arg2: i32) -> (i32, i32) {
    %c0_i32 = arith.constant 0 : i32
    %c0_i32_0 = arith.constant 0 : i32
    %c0_i32_1 = arith.constant 0 : i32
    return %c0_i32, %c0_i32_0 : i32, i32
  }
  func.func @transform_9(%arg0: i32, %arg1: i32, %arg2: i32) -> (i32, i32) {
    %c0_i32 = arith.constant 0 : i32
    %c0_i32_0 = arith.constant 0 : i32
    return %c0_i32, %arg2 : i32, i32
  }
  func.func @transform_10(%arg0: i32, %arg1: i32, %arg2: i32) -> (i32, i32) {
    %c0_i32 = arith.constant 0 : i32
    %c0_i32_0 = arith.constant 0 : i32
    return %c0_i32, %arg2 : i32, i32
  }
  func.func @transform_11(%arg0: i32, %arg1: i32, %arg2: i32) -> (i32, i32) {
    %c0_i32 = arith.constant 0 : i32
    %c0_i32_0 = arith.constant 0 : i32
    return %arg2, %c0_i32 : i32, i32
  }
  func.func @transform_12(%arg0: i32, %arg1: i32, %arg2: i32) -> (i32, i32, i32) {
    %c0_i32 = arith.constant 0 : i32
    %c0_i32_0 = arith.constant 0 : i32
    return %arg0, %arg1, %c0_i32 : i32, i32, i32
  }
}

</mosaic_0001>

<bundles_post_ra>
// kernel: tpu_custom_call.1
= control target key start
LH: loop header
LB: loop body
LE: loop exit
PB: predicated region body
PF: predicated region fallthrough
CT: control target
= control target key end

     0   :  { %17 = vsyncpa [#allocation7], 0  ;;  %s2476_s0 = inlined_call_operand.vmem [shape: f32[2,8,32], index: 0, kind: input, shape index: {}]   ;;  %s2477_s1 = inlined_call_operand.hbm [shape: f32[8,8], index: 1, kind: input, shape index: {}]   ;;  %s2478_s2 = inlined_call_operand.hbm [shape: f32[8,8], index: 2, kind: input, shape index: {}]   ;;  %s2479_s3 = inlined_call_operand.vmem [shape: f32[1,32], index: 3, kind: input, shape index: {}]   ;;  %s2480_s4 = inlined_call_operand.vmem [shape: bf16[32,32], index: 4, kind: input, shape index: {}]   ;;  %s2481_s5 = inlined_call_operand.vmem [shape: bf16[32,16], index: 5, kind: input, shape index: {}]   ;;  %s2482_s6 = inlined_call_operand.vmem [shape: bf16[32,16], index: 6, kind: input, shape index: {}]   ;;  %s2483_s7 = inlined_call_operand.vmem [shape: bf16[32,32], index: 7, kind: input, shape index: {}]   ;;  %s2484_s8 = inlined_call_operand.vmem [shape: f32[1,32], index: 8, kind: input, shape index: {}]   ;;  %s2485_s9 = inlined_call_operand.vmem [shape: bf16[32,64], index: 9, kind: input, shape index: {}]   ;;  %s2486_s10 = inlined_call_operand.vmem [shape: bf16[32,64], index: 10, kind: input, shape index: {}]   ;;  %s2487_s11 = inlined_call_operand.vmem [shape: bf16[64,32], index: 11, kind: input, shape index: {}]   ;;  %s2488_s12 = inlined_call_operand.hbm [shape: f32[2,8,32], index: 12, kind: output, shape index: {}]  }
   0x1   :  { %18 = vsyncpa [#allocation10], 0 }
   0x2   :  { %19 = vsyncpa [#allocation8], 0 }
   0x3   :  { %21 = vsyncpa [#allocation8 + $0x1], 0  ;;  %s2092_s21 = smov 0   ;;  %s2094_s22 = smov 0  }
   0x4   :  { %s2096_s23 = smov 0   ;;  %s2098_s24 = smov 0  }
   0x5   :  { %s2100_s25 = smov 0   ;;  %s2102_s26 = smov 0  }
   0x6 LB: > { %2498 = sst [smem:[#allocation15_spill]] %s1990_s21  ;;  %s1573_s27 = sadd.s32 4294967295, %s2010_s26   ;;  %s2010_s26 = sphi %s2102_s26, %s27_s26   ;;  %s2006_s25 = sphi %s2100_s25, %s2518_s25   ;;  %s2002_s24 = sphi %s2098_s24, %s2517_s24   ;;  %s1998_s23 = sphi %s2096_s23, %s2516_s23   ;;  %s1994_s22 = sphi %s2094_s22, %s2520_s22   ;;  %s1990_s21 = sphi %s2092_s21, %s2519_s21  }
   0x7   : > { %2499 = sst [smem:[#allocation16_spill]] %s1998_s23  ;;  %s1574_s28 = sadd.s32 4294967294, %s2010_s26  }
   0x8   : > { %2500 = sst [smem:[#allocation17_spill]] %s2006_s25  ;;  %s46_s29 = sadd.s32 1, %s2006_s25 }
   0x9   : > { %s327_s30 = sadd.s32 1, %s1998_s23  ;;  %p48_p0 = scmp.ge.s32.totalorder %s46_s29, 2 }
   0xa   : > { %p337_p1 = scmp.ne.s32.totalorder %s1998_s23, %s1994_s22  ;;  %p338_p2 = scmp.eq.s32.totalorder %s1573_s27, 1 }
   0xb   : > { %p343_p3 = scmp.ne.s32.totalorder %s1994_s22, %s1990_s21  ;;  %s2522_s29 = smov (%p48_p0, %s46_s29), 0 }
   0xc   : > { %2501 = sst [smem:[#allocation18_spill]] %s2522_s29  ;;  %p2132_p4 = por %p338_p2, %p337_p1 }
   0xd   : > { %p344_p5 = scmp.eq.s32.totalorder %s1574_s28, 1  ;;  %s322_s14 = ssub.s32 %s2006_s25, %s2522_s29 }
   0xe   : > { %s2502_s13 = scalar_select %p2132_p4, 1, 0 }
   0xf   : > { %p1575_p6 = scmp.ge.s32.totalorder %s2010_s26, 1  ;;  %p325_p7 = scmp.eq.s32.totalorder %s322_s14, 0 }
  0x10   : > { %p2139_p8 = por %p344_p5, %p343_p3  ;;  %p351_p9 = scmp.lt.s32.totalorder %s2010_s26, 3 }
  0x11   : > { %s2145_s16 = scalar_select %p325_p7, %s1998_s23, %s327_s30  }
  0x12   : > { %s2503_s15 = scalar_select %p2139_p8, 1, 0 }
  0x13   : > { %2505 = sst [smem:[#allocation20_spill]] %s2145_s16  ;;  %p2147_p10 = pnand %p1575_p6, %p351_p9 }
  0x14   : > { %2504 = sst [smem:[#allocation19_spill]] %s2503_s15  ;;  %p2151_p11 = scmp.eq.s32.totalorder %s1573_s27, 0 }
  0x15   : > { %s2506_s17 = scalar_select %p2147_p10, 1, 0 }
  0x16   : > { %s2507_s18 = scalar_select %p2151_p11, 1, 0 }
  0x17   : > { %p1750_p12 = pneg %p2147_p10  ;;  %s2012_s19 = smov [#allocation6]  }
  0x18   : > { %s364_s20 = sshll.u32 %s2012_s19, 4  ;;  %s2013_s28 = smov [#allocation9]   ;;  %s365_s20 = int_to_ptr.vmem [resolvable:$true] %s364_s20 }
  0x19   : > { %s375_s14 = sshll.u32 %s2013_s28, 4  ;;  %p2159_p13 = pnand %p2151_p11, %p1750_p12  ;;  %s2163_s14 = int_to_ptr.vmem [resolvable:$true] %s375_s14 }
  0x1a   : > { %s1868_s25 = scalar_lea.hbm %s2477_s1, 128 }
  0x1b   : > { %p1869_p0 = scmp.ne.s32.totalorder %s2477_s1, %s1868_s25  ;;  %p1870_p1 = pneg %p2159_p13 }
  0x1c   : > { %p1875_p5 = scmp.lt.u32.totalorder %s1868_s25, %s2477_s1 }
  0x1d   : > { %p1871_p2 = pnand %p1870_p1, %p1869_p0 }
  0x1f   : > { %p1872_p3 = pneg %p1871_p2 }
  0x21   : > { %p1877_p6 = pnand %p1875_p5, %p1872_p3 }
  0x23   : > { %1880 = shalt.err (!%p1877_p6)
}
  0x24   : > { %s1881_s15 = scalar_lea.vmem %s365_s20, 128  ;;  %p1889_p8 = scmp.lt.s32.totalorder %s365_s20, %s365_s20 }
  0x25   : > { %p1882_p7 = scmp.ne.s32.totalorder %s365_s20, %s1881_s15  ;;  %p1890_p4 = scmp.lt.s32.totalorder %s1881_s15, %s1881_s15 }
  0x27   : > { %p1884_p9 = pnand %p1882_p7, %p1870_p1  ;;  %p1891_p11 = por %p1890_p4, %p1889_p8 }
  0x29   : > { %p1885_p12 = pneg %p1884_p9 }
  0x2b   : > { %p1892_p10 = pnand %p1891_p11, %p1885_p12 }
  0x2d   : > { %1895 = shalt.err (!%p1892_p10)
}
  0x2e   : > { %1753 = dma.hbm_to_vmem [thread:$0]  (!%p2159_p13), %s2477_s1, 128, %s365_s20, [#allocation7]  }
  0x2f   : > { %s1896_s27 = scalar_lea.hbm %s2478_s2, 128 }
  0x30   : > { %p1897_p0 = scmp.ne.s32.totalorder %s2478_s2, %s1896_s27  ;;  %p1903_p10 = scmp.lt.u32.totalorder %s1896_s27, %s2478_s2 }
  0x32   : > { %p1899_p4 = pnand %p1897_p0, %p1870_p1 }
  0x34   : > { %p1900_p8 = pneg %p1899_p4 }
  0x36   : > { %p1905_p11 = pnand %p1903_p10, %p1900_p8 }
  0x38   : > { %1908 = shalt.err (!%p1905_p11)
}
  0x39   : > { %s1909_s20 = scalar_lea.vmem %s2163_s14, 128  ;;  %p1917_p6 = scmp.lt.s32.totalorder %s2163_s14, %s2163_s14 }
  0x3a   : > { %p1910_p2 = scmp.ne.s32.totalorder %s2163_s14, %s1909_s20  ;;  %p1918_p7 = scmp.lt.s32.totalorder %s1909_s20, %s1909_s20 }
  0x3c   : > { %p1912_p3 = pnand %p1910_p2, %p1870_p1  ;;  %p1919_p9 = por %p1918_p7, %p1917_p6 }
  0x3e   : > { %p1913_p5 = pneg %p1912_p3 }
  0x40   : > { %p1920_p12 = pnand %p1919_p9, %p1913_p5 }
  0x42   : > { %1923 = shalt.err (!%p1920_p12)
}
  0x43   : > { %1756 = dma.hbm_to_vmem [thread:$0]  (!%p2159_p13), %s2478_s2, 128, %s2163_s14, [#allocation10]  }
  0x44   : > { %p2509_p0 = scmp.ne.s32.totalorder %s2506_s17, 0 }
  0x45   : > { %p2510_p4 = scmp.ne.s32.totalorder (!%p2509_p0), %s2507_s18, 0 }
  0x46   : > { %436 = sbr.rel (%p2509_p0) target bundleno = 2669 (0xa6d), region = 68 }
  0x4d   : > { %1977 = dma.done.wait (%p2510_p4), [#allocation7], 128  }
  0x4e   : > { %1979 = vsyncadd (%p2510_p4), [#allocation7], 4294967168 }
  0x4f   : > { %1981 = dma.done.wait (%p2510_p4), [#allocation10], 128  }
  0x50   : > { %1983 = vsyncadd (%p2510_p4), [#allocation10], 4294967168  ;;  %p494_p1 = scmp.lt.s32.totalorder %s2002_s24, 1  ;;  %vm522_vm0 = vcmask 261120   ;;  %v1828_v3 = vld [vmem:[%s2481_s5] sm:$0xff]   ;;  %v2014_v4 = vmov 0.0  }
  0x51   : > { %1656 = vmatprep.subr.bf16.mxu1 %v2014_v4  ;;  %vm2015_vm1 = vmmov 0   ;;  %v1829_v5 = vld [vmem:[%s2481_s5 + $0x8] sm:$0xff]   ;;  %1672 = vmatprep.subr.bf16.mxu0 %v2014_v4  ;;  %v1831_v6 = vld [vmem:[%s2480_s4] sm:$0xff]   ;;  %vm540_vm2 = vcmask 257024   ;;  %vm672_vm3 = vcmask 60416   ;;  %s2016_s18 = smov 100  }
  0x52   : > { %s495_s30 = scalar_select %p494_p1, %s2002_s24, 1  ;;  %1660 = vmatprep.mubr.msk.bf16.mxu1 %vm2015_vm1, %v2014_v4  ;;  %1657 = vmatpush3.bf16.msra.mxu1 %v1828_v3  ;;  %v1833_v7 = vld [vmem:[%s2480_s4 + $0x8] sm:$0xff]   ;;  %v1587_v12 = vld [vmem:[%s2479_s3] ss:$0 sm:$0xff]  ;;  %vm901_vm4 = vcmask 1043456   ;;  %vm667_vm5 = vcmask 31744  }
  0x53   : > { %1658 = vmatprep.subr.bf16.mxu1 %v2014_v4  ;;  %1676 = vmatprep.mubr.msk.bf16.mxu0 %vm2015_vm1, %v2014_v4  ;;  %v1830_v15 = vld [vmem:[%s2482_s6] sm:$0xff]   ;;  %v1832_v17 = vld [vmem:[%s2482_s6 + $0x8] sm:$0xff]   ;;  %s2017_s16 = smov 108   ;;  %s2018_s27 = smov 124   ;;  %vm820_vm6 = vcmask 64512   ;;  %vm1120_vm8 = vcmask 130048  }
  0x54   : > { %s1586_s14 = sshll.u32 %s495_s30, 3  ;;  %1673 = vmatpush3.bf16.msra.mxu0 %v1831_v6  ;;  %v657_v19 = vld [vmem:[#allocation6] sm:$0xff]  ;;  %s2019_s19 = smov 8   ;;  %v779_v37 = vld [vmem:[#allocation9] sm:$0xff]  ;;  %vm1122_vm9 = vcmask 195584   ;;  %vm1366_vm10 = vcmask 523264  }
  0x55   : > { %s497_s25 = scalar_lea.vmem %s2476_s0, %s1586_s14  ;;  %1674 = vmatprep.subr.bf16.mxu0 %v2014_v4  ;;  %s2020_s28 = smov 116  }
  0x56   : > { %v2227_v0 = vld [vmem:[%s497_s25] sm:$0xff]  ;;  %1659 = vmatpush3.bf16.msra.mxu1 %v1829_v5  ;;  %s2021_s15 = smov 16   ;;  %s2022_s20 = smov 24  }
  0x57   : > { %v521_v1 = vmul.f32 %v2227_v0, %v2227_v0  ;;  %1664 = vmatprep.subr.bf16.mxu1 %v2014_v4  ;;  %s2023_s21 = smov 4   ;;  %s2024_s23 = smov 120  }
  0x58   : > { %1675 = vmatpush3.bf16.msra.mxu0 %v1833_v7  ;;  %s2025_s30 = smov 112   ;;  %p2511_p8 = scmp.ne.s32.totalorder %s2502_s13, 0 }
  0x59   : > { %v523_v2 = vsel %vm522_vm0, %v521_v1, 0.0  ;;  %1686 = vmatprep.subr.bf16.mxu0 %v2014_v4 }
  0x5a   : > { %524 = vadd.xlane.f32.xlu0 %v523_v2 }
  0xe7   : > { %v525_v8 = vpop.xlane.xlu0 %524 }
  0xe8   : > { %v527_v9 = vmul.f32 0.03125, %v525_v8 }
  0xea   : > { %v528_v10 = vadd.f32 1e-06, %v527_v9 }
  0xec   : > { %1844 = vrsqrt.f32 %v528_v10 }
  0xf6   : > { %v1845_v11 = vpop.eup %1844 }
  0xf7   : > { %v531_v13 = vmul.f32 %v1845_v11, %v2227_v0 }
  0xf9   : > { %v538_v14 = vmul.f32 %v1587_v12, %v531_v13 }
  0xfb   : > { %v539_v16 = vpack.c.bf16 %v538_v14, %v538_v14 }
  0xfd   : > { %541 = vst.msk [vmem:[#allocation2] sm:$0xf] %vm540_vm2, %v539_v16  ;;  %1661 = vmatmul.mubr.msk.bf16.vlgmr.msra.gmra.mrb[0].mxu1 %vm522_vm0, %v539_v16 }
  0xfe   : > { %1665 = vmatpush3.bf16.msra.mxu1 %v1830_v15  ;;  %1668 = vmatprep.mubr.msk.bf16.mxu1 %vm2015_vm1, %v2014_v4 }
  0xff   : > { %1666 = vmatprep.subr.bf16.mxu1 %v2014_v4 }
 0x102   : > { %1667 = vmatpush3.bf16.msra.mxu1 %v1832_v17 }
 0x103   : > { %1680 = vmatprep.subr.bf16.mxu1 %v2014_v4 }
 0x104   : > { %v715_v18 = vld [vmem:[#allocation2] sm:$0xf] }
 0x105   : > { %1669 = vmatmul.mubr.msk.bf16.vlgmr.msra.gmra.mrb[4].mxu1 %vm522_vm0, %v539_v16  ;;  %1677 = vmatmul.mubr.msk.bf16.vlgmr.msra.gmra.mrb[0].mxu0 %vm522_vm0, %v715_v18 }
 0x106   : > { %1682 = vmatprep.mubr.msk.bf16.mxu1 %vm2015_vm1, %v2014_v4  ;;  %1688 = vmatprep.mubr.msk.bf16.mxu0 %vm2015_vm1, %v2014_v4 }
 0x1d0   : > { %v2275_v20 = vpop.f32.mrb[0].mxu1 }
 0x1d1   : > { %v1662_v21 = vpop.f32.mrb[1].mxu1  ;;  %v2278_v22 = vmul.f32 %v657_v19, %v2275_v20 }
 0x1d2   : > { %v598_v23 = vpop.f32.mrb[2].mxu1 }
 0x1d3   : > { %v1663_v24 = vpop.f32.mrb[3].mxu1 }
 0x1d8   : > { %v651_v25 = vpop.f32.mrb[4].mxu1  ;;  %v2280_v26 = vpop.f32.mrb[0].mxu0 }
 0x1d9   : > { %v2282_v27 = vpack.c.bf16 %v651_v25, %v651_v25  ;;  %v1670_v28 = vpop.f32.mrb[5].mxu1  ;;  %964 = vrot.lane.b32.xlu1 %v2280_v26, %s2016_s18  ;;  %950 = vrot.lane.b32.xlu0 %v2280_v26, %s2017_s16  ;;  %v1678_v29 = vpop.f32.mrb[1].mxu0  ;;  %v2287_v30 = vmul.f32 %v2280_v26, %v657_v19  ;;  %s491_s18 = sand.u32 1, %s1994_s22  }
 0x1da   : > { %v654_v31 = vpop.f32.mrb[6].mxu1  ;;  %v773_v32 = vpop.f32.mrb[2].mxu0  ;;  %s1585_s16 = sshll.u32 %s491_s18, 3 }
 0x1db   : > { %675 = vst.msk [vmem:[#allocation4] sm:$0xf] %vm672_vm3, %v2282_v27  ;;  %v1671_v33 = vpop.f32.mrb[7].mxu1  ;;  %v1679_v34 = vpop.f32.mrb[3].mxu0 }
 0x1dd   : > { %661 = vrot.lane.b32.xlu1 %v2275_v20, %s2018_s27  ;;  %677 = vrot.lane.b32.xlu0 %v657_v19, %s2019_s19 }
 0x1e1   : > { %681 = vrot.lane.b32.xlu1 %v2275_v20, %s2020_s28  ;;  %800 = vrot.lane.b32.xlu0 %v657_v19, %s2019_s19 }
 0x1e2   : > { %v897_v35 = vld [vmem:[#allocation4] sm:$0xf] }
 0x1e3   : > { %v903_v36 = vsel %vm901_vm4, %v897_v35, 0 }
 0x1e4   : > { %1687 = vmatpush3.bf16.msra.mxu0 %v903_v36 }
 0x1e5   : > { %789 = vrot.lane.b32.xlu1 %v2280_v26, %s2018_s27  ;;  %946 = vrot.lane.b32.xlu0 %v657_v19, %s2021_s15  ;;  %s2376_s27 = scalar_lea.vmem [#allocation11], %s1585_s16 }
 0x1e6   : > { %1698 = vmatprep.subr.bf16.mxu0 %v2014_v4  ;;  %s1427_s14 = sshll.u32 %s2376_s27, 4  ;;  %s2427_s14 = int_to_ptr.vmem [resolvable:$true] %s1427_s14 }
 0x1e7   : > { %s1924_s16 = scalar_lea.vmem %s2427_s14, 128 }
 0x1e8   : > { %p1925_p13 = scmp.ne.s32.totalorder %s2427_s14, %s1924_s16 }
 0x1e9   : > { %804 = vrot.lane.b32.xlu1 %v2280_v26, %s2020_s28 }
 0x1ea   : > { %p1926_p10 = pnand %p1925_p13, %p2511_p8 }
 0x1ec   : > { %p1927_p11 = pneg %p1926_p10 }
 0x1ed   : > { %960 = vrot.lane.b32.xlu1 %v657_v19, %s2022_s20 }
 0x24b   : > { %v965_v38 = vpop.permute.xlu1 %964  ;;  %v951_v39 = vpop.permute.xlu0 %950 }
 0x24c   : > { %v967_v40 = vsel %vm667_vm5, %v965_v38, %v951_v39 }
 0x24d   : > { %v968_v41 = vmul.f32 %v967_v40, %v779_v37 }
 0x24f   : > { %v662_v42 = vpop.permute.xlu1 %661  ;;  %970 = vrot.lane.b32.xlu1 %v968_v41, %s2022_s20  ;;  %v678_v56 = vpop.permute.xlu0 %677 }
 0x250   : > { %v680_v57 = vmul.f32 %v678_v56, %v2275_v20 }
 0x253   : > { %v682_v43 = vpop.permute.xlu1 %681  ;;  %v801_v60 = vpop.permute.xlu0 %800 }
 0x254   : > { %v684_v44 = vsel %vm667_vm5, %v682_v43, %v662_v42  ;;  %v803_v62 = vmul.f32 %v801_v60, %v2280_v26 }
 0x255   : > { %v685_v45 = vmul.f32 %v779_v37, %v684_v44 }
 0x257   : > { %v790_v46 = vpop.permute.xlu1 %789  ;;  %687 = vrot.lane.b32.xlu1 %v685_v45, %s2019_s19  ;;  %v947_v63 = vpop.permute.xlu0 %946 }
 0x258   : > { %v949_v3 = vmul.f32 %v947_v63, %v2280_v26 }
 0x25b   : > { %v805_v47 = vpop.permute.xlu1 %804 }
 0x25c   : > { %v807_v48 = vsel %vm667_vm5, %v805_v47, %v790_v46  ;;  %v953_v50 = vsel %vm667_vm5, %v951_v39, %v805_v47 }
 0x25d   : > { %v808_v49 = vmul.f32 %v807_v48, %v779_v37  ;;  %v954_v51 = vmul.f32 %v953_v50, %v779_v37 }
 0x25f   : > { %810 = vrot.lane.b32.xlu1 %v808_v49, %s2019_s19  ;;  %v961_v52 = vpop.permute.xlu1 %960 }
 0x260   : > { %v963_v53 = vmul.f32 %v961_v52, %v2280_v26 }
 0x263   : > { %956 = vrot.lane.b32.xlu1 %v954_v51, %s2021_s15 }
 0x267   : > { %664 = vrot.lane.b32.xlu1 %v2275_v20, %s2023_s21 }
 0x26b   : > { %792 = vrot.lane.b32.xlu1 %v2280_v26, %s2023_s21  ;;  %v780_v26 = vlaneseq }
 0x26d   : > { %v781_v28 = vshrl.u32 %v780_v26, 7  ;;  %v785_v29 = vand.u32 127, %v780_v26 }
 0x26f   : > { %vm786_vm7 = vcmp.le.s32.totalorder %v785_v29, %v781_v28  ;;  %v1834_v29 = vld [vmem:[%s2483_s7] sm:$0xff]  }
 0x2c1   : > { %v971_v54 = vpop.permute.xlu1 %970 }
 0x2c2   : > { %v973_v55 = vadd.f32 %v971_v54, %v963_v53 }
 0x2c4   : > { %975 = vrot.lane.b32.xlu0 %v973_v55, %s2024_s23 }
 0x2c9   : > { %v688_v58 = vpop.permute.xlu1 %687 }
 0x2ca   : > { %v690_v59 = vadd.f32 %v688_v58, %v680_v57 }
 0x2cc   : > { %v1623_v61 = vpack.c.bf16 %v690_v59, %v690_v59 }
 0x2ce   : > { %695 = vrot.lane.b32.xlu0 %v1623_v61, %s2024_s23 }
 0x2d1   : > { %v811_v1 = vpop.permute.xlu1 %810 }
 0x2d2   : > { %v813_v2 = vadd.f32 %v811_v1, %v803_v62 }
 0x2d4   : > { %815 = vrot.lane.b32.xlu0 %v813_v2, %s2024_s23 }
 0x2d5   : > { %v957_v5 = vpop.permute.xlu1 %956 }
 0x2d6   : > { %v959_v6 = vadd.f32 %v957_v5, %v949_v3 }
 0x2d9   : > { %v665_v7 = vpop.permute.xlu1 %664 }
 0x2da   : > { %v668_v8 = vsel %vm667_vm5, %v662_v42, %v665_v7 }
 0x2db   : > { %v669_v9 = vmul.f32 %v779_v37, %v668_v8 }
 0x2dd   : > { %v670_v10 = vadd.f32 %v669_v9, %v2278_v22  ;;  %v793_v16 = vpop.permute.xlu1 %792 }
 0x2de   : > { %v796_v17 = vsel %vm667_vm5, %v790_v46, %v793_v16 }
 0x2df   : > { %v671_v11 = vpack.c.bf16 %v670_v10, %v670_v10  ;;  %v797_v19 = vmul.f32 %v796_v17, %v779_v37 }
 0x2e1   : > { %673 = vst.msk [vmem:[#allocation3] sm:$0xf] %vm672_vm3, %v671_v11  ;;  %v798_v20 = vadd.f32 %v797_v19, %v2287_v30 }
 0x2e8   : > { %v819_v12 = vld [vmem:[#allocation3] sm:$0xf] }
 0x2e9   : > { %v825_v13 = vsel %vm820_vm6, %v819_v12, 0 }
 0x2ea   : > { %1681 = vmatpush3.bf16.xpose.msra.mxu1 %v825_v13 }
 0x2eb   : > { %1692 = vmatprep.subr.bf16.mxu1 %v2014_v4 }
 0x336   : > { %v976_v14 = vpop.permute.xlu0 %975 }
 0x337   : > { %v978_v15 = vpack.c.bf16 %v976_v14, %v959_v6 }
 0x339   : > { %982 = vrot.lane.b32.xlu1 %v978_v15, %s2025_s30  ;;  %s1620_s30 = sshll.u32 %s2002_s24, 7  ;;  %s1413_s24 = scalar_lea.sflag [#allocation8], %s491_s18 }
 0x33a   : > { %s2425_s25 = scalar_lea.hbm %s2488_s12, %s1620_s30 }
 0x340   : > { %v696_v18 = vpop.permute.xlu0 %695 }
 0x341   : > { %699 = vst.msk [vmem:[#allocation3 + $0x4] sm:$0xf] %vm672_vm3, %v696_v18 }
 0x346   : > { %v816_v21 = vpop.permute.xlu0 %815 }
 0x347   : > { %v818_v22 = vpack.c.bf16 %v816_v21, %v798_v20 }
 0x348   : > { %v980_v23 = vld [vmem:[#allocation3 + $0x4] sm:$0xf] }
 0x349   : > { %1683 = vmatmul.mubr.msk.bf16.vlgmr.msra.gmra.mrb[8].mxu1 %vm820_vm6, %v818_v22  ;;  %v988_v24 = vsel %vm820_vm6, %v980_v23, 0 }
 0x34a   : > { %1693 = vmatpush3.bf16.xpose.msra.mxu1 %v988_v24  ;;  %1694 = vmatprep.mubr.msk.bf16.mxu1 %vm2015_vm1, %v2014_v4 }
 0x34b   : > { %1704 = vmatprep.subr.bf16.mxu1 %v2014_v4 }
 0x3ab   : > { %v983_v25 = vpop.permute.xlu1 %982 }
 0x3ac   : > { %1695 = vmatmul.mubr.msk.bf16.vlgmr.msra.gmra.mrb[12].mxu1 %vm820_vm6, %v983_v25 }
 0x3ad   : > { %1708 = vmatprep.mubr.msk.bf16.mxu1 %vm2015_vm1, %v2014_v4  ;;  %1705 = vmatpush3.bf16.msra.mxu1 %v1834_v29 }
 0x3ae   : > { %1706 = vmatprep.subr.bf16.mxu1 %v2014_v4 }
 0x41c   : > { %v861_v30 = vpop.f32.mrb[8].mxu1 }
 0x41d   : > { %v868_v31 = vmul.f32 0.35355338, %v861_v30  ;;  %v1684_v32 = vpop.f32.mrb[9].mxu1  ;;  %v1835_v30 = vld [vmem:[%s2483_s7 + $0x8] sm:$0xff]  }
 0x41e   : > { %v864_v33 = vpop.f32.mrb[10].mxu1  ;;  %1707 = vmatpush3.bf16.msra.mxu1 %v1835_v30 }
 0x41f   : > { %v869_v34 = vmul.f32 0.35355338, %v864_v33  ;;  %v1685_v35 = vpop.f32.mrb[11].mxu1  ;;  %v872_v36 = vsel %vm786_vm7, %v868_v31, -1e+30  ;;  %1720 = vmatprep.subr.bf16.mxu1 %v2014_v4 }
 0x420   : > { %v874_v37 = vsel %vm820_vm6, %v872_v36, -inf }
 0x421   : > { %875 = vmax.xlane.f32.xlu0 %v874_v37  ;;  %v873_v38 = vsel %vm786_vm7, %v869_v34, -1e+30 }
 0x422   : > { %v877_v39 = vsel %vm820_vm6, %v873_v38, -inf }
 0x423   : > { %878 = vmax.xlane.f32.xlu1 %v877_v39 }
 0x47f   : > { %v1024_v40 = vpop.f32.mrb[12].mxu1 }
 0x480   : > { %v1031_v41 = vmul.f32 0.35355338, %v1024_v40  ;;  %v1696_v42 = vpop.f32.mrb[13].mxu1 }
 0x481   : > { %v1027_v43 = vpop.f32.mrb[14].mxu1 }
 0x482   : > { %v1032_v44 = vmul.f32 0.35355338, %v1027_v43  ;;  %v1697_v45 = vpop.f32.mrb[15].mxu1  ;;  %v1033_v46 = vsel %vm786_vm7, %v1031_v41, -1e+30 }
 0x483   : > { %v1035_v47 = vsel %vm820_vm6, %v1033_v46, -inf }
 0x484   : > { %1036 = vmax.xlane.f32.xlu0 %v1035_v47  ;;  %v1034_v48 = vsel %vm786_vm7, %v1032_v44, -1e+30 }
 0x485   : > { %v1038_v49 = vsel %vm820_vm6, %v1034_v48, -inf }
 0x488   : > { %1039 = vmax.xlane.f32.xlu0 %v1038_v49  ;;  %v1836_v49 = vld [vmem:[%s2485_s9] sm:$0xff]  }
 0x4ae   : > { %v876_v50 = vpop.xlane.xlu0 %875 }
 0x4af   : > { %v880_v51 = vsub.f32 %v872_v36, %v876_v50  ;;  %v1838_v50 = vld [vmem:[%s2485_s9 + $0x8] sm:$0xff]  }
 0x4b0   : > { %v879_v52 = vpop.xlane.xlu1 %878 }
 0x4b1   : > { %v882_v53 = vmul.f32 1.442695, %v880_v51  ;;  %v881_v54 = vsub.f32 %v873_v38, %v879_v52  ;;  %v1839_v51 = vld [vmem:[%s2486_s10 + $0x8] sm:$0xff]  }
 0x4b3   : > { %1846 = vpow2.f32 %v882_v53  ;;  %v884_v55 = vmul.f32 1.442695, %v881_v54 }
 0x4b5   : > { %1848 = vpow2.f32 %v884_v55 }
 0x4bd   : > { %v1847_v56 = vpop.eup %1846 }
 0x4be   : > { %v886_v57 = vsel %vm820_vm6, %v1847_v56, 0.0 }
 0x4bf   : > { %v1849_v58 = vpop.eup %1848  ;;  %887 = vadd.xlane.f32.xlu1 %v886_v57 }
 0x4c0   : > { %v889_v59 = vsel %vm820_vm6, %v1849_v58, 0.0 }
 0x4c1   : > { %890 = vadd.xlane.f32.xlu0 %v889_v59 }
 0x511   : > { %v1037_v60 = vpop.xlane.xlu0 %1036 }
 0x512   : > { %v1041_v61 = vsub.f32 %v1033_v46, %v1037_v60 }
 0x514   : > { %v1043_v62 = vmul.f32 1.442695, %v1041_v61  ;;  %v1840_v61 = vld [vmem:[%s2487_s11] sm:$0xff]  }
 0x515   : > { %v1040_v63 = vpop.xlane.xlu0 %1039 }
 0x516   : > { %1850 = vpow2.f32 %v1043_v62  ;;  %v1042_v1 = vsub.f32 %v1034_v48, %v1040_v63  ;;  %v1841_v62 = vld [vmem:[%s2487_s11 + $0x8] sm:$0xff]   ;;  %v1842_v63 = vld [vmem:[%s2487_s11 + $0x10] sm:$0xff]  }
 0x518   : > { %v1045_v2 = vmul.f32 1.442695, %v1042_v1  ;;  %v1843_v1 = vld [vmem:[%s2487_s11 + $0x18] sm:$0xff]  }
 0x51a   : > { %1852 = vpow2.f32 %v1045_v2 }
 0x520   : > { %v1851_v3 = vpop.eup %1850 }
 0x521   : > { %v1047_v5 = vsel %vm820_vm6, %v1851_v3, 0.0 }
 0x522   : > { %1048 = vadd.xlane.f32.xlu1 %v1047_v5 }
 0x524   : > { %v1853_v6 = vpop.eup %1852 }
 0x525   : > { %v1050_v7 = vsel %vm820_vm6, %v1853_v6, 0.0 }
 0x526   : > { %1051 = vadd.xlane.f32.xlu0 %v1050_v7 }
 0x533   : > { %703 = vrot.lane.b32.xlu1 %v2282_v27, %s2024_s23 }
 0x54c   : > { %v888_v8 = vpop.xlane.xlu1 %887 }
 0x54d   : > { %1854 = vrcp.f32 %v888_v8 }
 0x54e   : > { %v891_v9 = vpop.xlane.xlu0 %890 }
 0x54f   : > { %1856 = vrcp.f32 %v891_v9 }
 0x557   : > { %v1855_v10 = vpop.eup %1854 }
 0x558   : > { %v893_v12 = vmul.f32 %v1855_v10, %v1847_v56  ;;  %v1606_v56 = vld [vmem:[%s2484_s8] ss:$0 sm:$0xff] }
 0x559   : > { %v1857_v11 = vpop.eup %1856 }
 0x55a   : > { %v895_v13 = vmul.f32 %v1857_v11, %v1849_v58 }
 0x55c   : > { %v896_v14 = vpack.c.bf16 %v895_v13, %v893_v12 }
 0x55e   : > { %1689 = vmatmul.mubr.msk.bf16.vlgmr.msra.gmra.mrb[4].mxu0 %vm820_vm6, %v896_v14 }
 0x55f   : > { %1700 = vmatprep.mubr.msk.bf16.mxu0 %vm2015_vm1, %v2014_v4 }
 0x5af   : > { %v1049_v15 = vpop.xlane.xlu1 %1048 }
 0x5b0   : > { %1858 = vrcp.f32 %v1049_v15 }
 0x5b3   : > { %v704_v16 = vpop.permute.xlu1 %703  ;;  %v1052_v17 = vpop.xlane.xlu0 %1051 }
 0x5b4   : > { %707 = vst.msk [vmem:[#allocation4 + $0x4] sm:$0xf] %vm672_vm3, %v704_v16  ;;  %1860 = vrcp.f32 %v1052_v17 }
 0x5ba   : > { %v1859_v18 = vpop.eup %1858 }
 0x5bb   : > { %v1059_v27 = vld [vmem:[#allocation4 + $0x4] sm:$0xf]  ;;  %v1054_v21 = vmul.f32 %v1859_v18, %v1851_v3 }
 0x5bc   : > { %v1064_v19 = vsel %vm901_vm4, %v1059_v27, 0 }
 0x5bd   : > { %1699 = vmatpush3.bf16.msra.mxu0 %v1064_v19 }
 0x5be   : > { %v1861_v20 = vpop.eup %1860  ;;  %1712 = vmatprep.subr.bf16.mxu0 %v2014_v4 }
 0x5bf   : > { %v1056_v22 = vmul.f32 %v1861_v20, %v1853_v6 }
 0x5c1   : > { %v1057_v23 = vpack.c.bf16 %v1056_v22, %v1054_v21 }
 0x5c3   : > { %1701 = vmatmul.mubr.msk.bf16.vlgmr.msra.gmra.mrb[8].mxu0 %vm820_vm6, %v1057_v23 }
 0x5c4   : > { %1716 = vmatprep.mubr.msk.bf16.mxu0 %vm2015_vm1, %v2014_v4  ;;  %1713 = vmatpush3.bf16.msra.mxu0 %v1836_v49 }
 0x5c5   : > { %1714 = vmatprep.subr.bf16.mxu0 %v2014_v4 }
 0x5c8   : > { %1715 = vmatpush3.bf16.msra.mxu0 %v1838_v50 }
 0x5c9   : > { %1728 = vmatprep.subr.bf16.mxu0 %v2014_v4 }
 0x631   : > { %v939_v24 = vpop.f32.mrb[4].mxu0 }
 0x632   : > { %v1690_v25 = vpop.f32.mrb[5].mxu0 }
 0x633   : > { %v942_v26 = vpop.f32.mrb[6].mxu0 }
 0x634   : > { %1108 = vrot.lane.b32.xlu0 %v942_v26, %s2019_s19  ;;  %v1691_v28 = vpop.f32.mrb[7].mxu0  ;;  %s2026_s19 = smov [#allocation11]  }
 0x635   : > { %s1928_s28 = sshll.u32 %s2026_s19, 4  ;;  %s1929_s28 = int_to_ptr.vmem [resolvable:$false] %s1928_s28 }
 0x636   : > { %p1931_p2 = scmp.lt.s32.totalorder %s2427_s14, %s1929_s28 }
 0x696   : > { %v1100_v31 = vpop.f32.mrb[8].mxu0 }
 0x697   : > { %1112 = vrot.lane.b32.xlu1 %v1100_v31, %s2021_s15  ;;  %v1702_v32 = vpop.f32.mrb[9].mxu0  ;;  %s1930_s15 = scalar_lea.vmem %s1929_s28, 256 }
 0x698   : > { %v1103_v33 = vpop.f32.mrb[10].mxu0  ;;  %p1932_p3 = scmp.lt.s32.totalorder %s1930_s15, %s1924_s16 }
 0x699   : > { %v1703_v34 = vpop.f32.mrb[11].mxu0 }
 0x69a   : > { %p1933_p5 = por %p1932_p3, %p1931_p2 }
 0x69b   : > { %1116 = vrot.lane.b32.xlu1 %v1103_v33, %s2022_s20 }
 0x69c   : > { %p1934_p6 = pnand %p1933_p5, %p1927_p11 }
 0x6a6   : > { %v1109_v35 = vpop.permute.xlu0 %1108 }
 0x6a7   : > { %v1119_v37 = vsel %vm820_vm6, %v939_v24, %v1109_v35 }
 0x709   : > { %v1113_v36 = vpop.permute.xlu1 %1112 }
 0x70a   : > { %v1121_v38 = vsel %vm1120_vm8, %v1119_v37, %v1113_v36 }
 0x70d   : > { %v1117_v39 = vpop.permute.xlu1 %1116 }
 0x70e   : > { %v1123_v40 = vsel %vm1122_vm9, %v1121_v38, %v1117_v39 }
 0x70f   : > { %v1124_v41 = vpack.c.bf16 %v1123_v40, %v1123_v40 }
 0x711   : > { %1709 = vmatmul.mubr.msk.bf16.vlgmr.msra.gmra.mrb[16].mxu1 %vm522_vm0, %v1124_v41 }
 0x712   : > { %1724 = vmatprep.mubr.msk.bf16.mxu1 %vm2015_vm1, %v2014_v4 }
 0x7e4   : > { %v1180_v42 = vpop.f32.mrb[16].mxu1 }
 0x7e5   : > { %v1186_v43 = vadd.f32 %v1180_v42, %v2227_v0  ;;  %v1710_v44 = vpop.f32.mrb[17].mxu1  ;;  %v1837_v0 = vld [vmem:[%s2486_s10] sm:$0xff]  }
 0x7e6   : > { %v1183_v45 = vpop.f32.mrb[18].mxu1  ;;  %1721 = vmatpush3.bf16.msra.mxu1 %v1837_v0 }
 0x7e7   : > { %v1711_v46 = vpop.f32.mrb[19].mxu1  ;;  %v1188_v47 = vmul.f32 %v1186_v43, %v1186_v43  ;;  %1187 = vst.msk [vmem:[%s2376_s27] sm:$0xff] %vm522_vm0, %v1186_v43  ;;  %1722 = vmatprep.subr.bf16.mxu1 %v2014_v4 }
 0x7e9   : > { %v1189_v48 = vsel %vm522_vm0, %v1188_v47, 0.0 }
 0x7ea   : > { %1190 = vadd.xlane.f32.xlu0 %v1189_v48  ;;  %1723 = vmatpush3.bf16.msra.mxu1 %v1839_v51 }
 0x7ee   : > { %v1332_v17 = vld [vmem:[%s2376_s27] sm:$0xff] }
 0x877   : > { %v1191_v52 = vpop.xlane.xlu0 %1190 }
 0x878   : > { %v1193_v53 = vmul.f32 0.03125, %v1191_v52 }
 0x87a   : > { %v1194_v54 = vadd.f32 1e-06, %v1193_v53 }
 0x87c   : > { %1862 = vrsqrt.f32 %v1194_v54 }
 0x886   : > { %v1863_v55 = vpop.eup %1862 }
 0x887   : > { %v1197_v57 = vmul.f32 %v1863_v55, %v1186_v43 }
 0x889   : > { %v1204_v58 = vmul.f32 %v1606_v56, %v1197_v57 }
 0x88b   : > { %1205 = vst.msk [vmem:[#allocation5] sm:$0xff] %vm522_vm0, %v1204_v58 }
 0x892   : > { %v1206_v59 = vld [vmem:[#allocation5] sm:$0xff] }
 0x893   : > { %v1207_v60 = vpack.c.bf16 %v1206_v59, %v1206_v59 }
 0x895   : > { %1717 = vmatmul.mubr.msk.bf16.vlgmr.msra.gmra.mrb[12].mxu0 %vm522_vm0, %v1207_v60  ;;  %1725 = vmatmul.mubr.msk.bf16.vlgmr.msra.gmra.mrb[20].mxu1 %vm522_vm0, %v1207_v60 }
 0x896   : > { %1736 = vmatprep.mubr.msk.bf16.mxu0 %vm2015_vm1, %v2014_v4  ;;  %1729 = vmatpush3.bf16.msra.mxu0 %v1840_v61 }
 0x897   : > { %1730 = vmatprep.subr.bf16.mxu0 %v2014_v4 }
 0x89a   : > { %1731 = vmatpush3.bf16.msra.mxu0 %v1841_v62 }
 0x89b   : > { %1732 = vmatprep.subr.bf16.mxu0 %v2014_v4 }
 0x89e   : > { %1733 = vmatpush3.bf16.msra.mxu0 %v1842_v63 }
 0x89f   : > { %1734 = vmatprep.subr.bf16.mxu0 %v2014_v4 }
 0x8a2   : > { %1735 = vmatpush3.bf16.msra.mxu0 %v1843_v1 }
 0x968   : > { %v1262_v2 = vpop.f32.mrb[12].mxu0  ;;  %v1318_v3 = vpop.f32.mrb[20].mxu1 }
 0x969   : > { %v1613_v5 = vmul.f32 -1.442695, %v1262_v2  ;;  %v1718_v6 = vpop.f32.mrb[13].mxu0  ;;  %v1726_v7 = vpop.f32.mrb[21].mxu1 }
 0x96a   : > { %v1265_v8 = vpop.f32.mrb[14].mxu0  ;;  %v1321_v9 = vpop.f32.mrb[22].mxu1 }
 0x96b   : > { %1864 = vpow2.f32 %v1613_v5  ;;  %v1719_v10 = vpop.f32.mrb[15].mxu0  ;;  %v1727_v11 = vpop.f32.mrb[23].mxu1 }
 0x975   : > { %v1865_v12 = vpop.eup %1864 }
 0x976   : > { %v1327_v4 = vadd.f32 1.0, %v1865_v12 }
 0x978   : > { %1866 = vrcp.f32 %v1327_v4 }
 0x982   : > { %v1867_v13 = vpop.eup %1866 }
 0x983   : > { %v1330_v14 = vmul.f32 %v1867_v13, %v1262_v2 }
 0x985   : > { %v1331_v15 = vmul.f32 %v1330_v14, %v1318_v3 }
 0x987   : > { %v1333_v16 = vpack.c.bf16 %v1331_v15, %v1331_v15 }
 0x989   : > { %1737 = vmatmul.mubr.msk.bf16.vlgmr.msra.gmra.mrb[16].mxu0 %vm1366_vm10, %v1333_v16 }
 0xa5c   : > { %v1404_v27 = vpop.f32.mrb[16].mxu0 }
 0xa5d   : > { %v1410_v18 = vadd.f32 %v1404_v27, %v1332_v17  ;;  %v1738_v19 = vpop.f32.mrb[17].mxu0 }
 0xa5e   : > { %v1407_v20 = vpop.f32.mrb[18].mxu0 }
 0xa5f   : > { %1411 = vst.msk [vmem:[%s2376_s27] sm:$0xff] %vm522_vm0, %v1410_v18  ;;  %v1739_v21 = vpop.f32.mrb[19].mxu0 }
 0xa60   : > { %1937 = shalt.err (!%p1934_p6)
}
 0xa61   : > { %s1938_s18 = scalar_lea.hbm %s2425_s25, 128  ;;  %s1942_s21 = scalar_lea.hbm %s2488_s12, 256 }
 0xa62   : > { %p1939_p7 = scmp.ne.s32.totalorder %s2425_s25, %s1938_s18  ;;  %p1943_p0 = scmp.lt.u32.totalorder %s2425_s25, %s2488_s12 }
 0xa63   : > { %p1944_p4 = scmp.lt.u32.totalorder %s1942_s21, %s1938_s18  ;;  %p1946_p13 = scmp.lt.u32.totalorder %s1938_s18, %s2425_s25 }
 0xa64   : > { %p1940_p9 = pnand %p1939_p7, %p2511_p8 }
 0xa65   : > { %p1945_p1 = por %p1944_p4, %p1943_p0 }
 0xa66   : > { %p1941_p12 = pneg %p1940_p9 }
 0xa67   : > { %p1947_p10 = por %p1946_p13, %p1945_p1 }
 0xa69   : > { %p1948_p11 = pnand %p1947_p10, %p1941_p12 }
 0xa6b   : > { %1951 = shalt.err (!%p1948_p11)
}
 0xa6c   : > { %1748 = dma.vmem_to_hbm [thread:$0]  (%p2511_p8), %s2427_s14, 128, %s2425_s25, %s1413_s24  }
 0xa6d PF: > { %s2512_s29 = sld [smem:[#allocation15_spill]]  ;;  %s2513_s17 = sld [smem:[#allocation19_spill]] }
 0xa6e   : > { %p1765_p2 = scmp.ge.s32.totalorder %s2010_s26, 2 }
 0xa73   : > { %s1439_s16 = sand.u32 1, %s2512_s29   ;;  %p2514_p3 = scmp.ne.s32.totalorder %s2513_s17, 0 }
 0xa74   : > { %s1440_s19 = scalar_lea.sflag [#allocation8], %s1439_s16 }
 0xa75   : > { %p1758_p5 = pnand %p1765_p2, %p2514_p3 }
 0xa77   : > { %1985 = dma.done.wait (!%p1758_p5), %s1440_s19, 128  }
 0xa78   : > { %1987 = vsyncadd (!%p1758_p5), %s1440_s19, 4294967168  ;;  %s27_s26 = sadd.s32 1, %s2010_s26   ;;  %s2515_s28 = sld [smem:[#allocation16_spill]] }
 0xa79   : > { %p24_p6 = scmp.ge.s32.totalorder %s27_s26, 4   ;;  %s2516_s23 = sld [smem:[#allocation20_spill]] }
 0xa7a   : > { %s2517_s24 = sld [smem:[#allocation17_spill]]  ;;  %s2518_s25 = sld [smem:[#allocation18_spill]] }
 0xa7b   : > { %s2519_s21 = smov %s1994_s22  ;;  %26 = sbr.rel (!%p24_p6) target bundleno = 6 (0x6), region = 137 }
 0xa7e   : > { %s2520_s22 = smov %s2515_s28 }
 0xa82   :  { %1445 = vsyncpa [#allocation7], 1 }
 0xa83   :  { %1447 = vsyncpa [#allocation7 + $0x1], 1 }
 0xa84   :  { %1448 = vsyncpa [#allocation10], 1 }
 0xa85   :  { %1449 = vsyncpa [#allocation8], 1 }
 0xa86   :  { %1451 = vsyncpa [#allocation8 + $0x1], 1 }

</bundles_post_ra>
